<compile_context>
chip_gen: v7x
topology: tpu7x:2x2x1
jax: 0.10.0
libtpu: 0.0.40
codegen_flags: <defaults>
</compile_context>

<pallas_src>
import functools

import jax
import jax.numpy as jnp
from jax.experimental import pallas as pl
from jax.experimental.pallas import tpu as pltpu

MAX_ITER = 3


def _lbp_kernel(s_span_ref, s_pair_ref, mask_t_ref,
                logit0_ref, logit1_ref, marg_ref, *, max_iter):
    # One grid step == one block of batch elements; all tensors in natural layout.
    s_span = s_span_ref[...]            # [Bt, L, L]
    s_pair = s_pair_ref[...]            # [Bt, L, L, L]
    mask_t = mask_t_ref[...]            # [Bt, L, L]  (transposed span mask, f32)
    L = s_span.shape[-1]

    # Second-order mask rebuilt in-kernel from iotas (no HBM traffic):
    # g[d, a1, a2] = (d != a1) * (d != a2)
    row = jax.lax.broadcasted_iota(jnp.int32, (L, L), 0)
    col = jax.lax.broadcasted_iota(jnp.int32, (L, L), 1)
    neq = (row != col).astype(jnp.float32)          # [L, L]
    g = (neq[:, :, None] * neq[:, None, :])[None]   # [1, L, L, L]

    def lae(a, b):  # stable 2-way logaddexp; exp/log land on the EUP slot
        m = jnp.maximum(a, b)
        return m + jnp.log(1.0 + jnp.exp(-jnp.abs(a - b)))

    q0 = jnp.zeros_like(s_span)
    q1 = s_span
    mp0 = jnp.zeros_like(s_pair)
    mp1 = jnp.zeros_like(s_pair)

    for _ in range(max_iter):                       # max_iter is small & static
        # log-softmax over the 2 labels
        lse = lae(q0, q1)
        q0n = q0 - lse
        q1n = q1 - lse
        # pair-message update (all elementwise, natural layouts)
        m0 = q0n[..., None] - mp0
        m1 = q1n[..., None] - mp1
        n0 = lae(m0, m1)
        n1 = lae(m0, m1 + s_pair)
        lse2 = lae(n0, n1)
        mp0 = n0 - lse2
        mp1 = n1 - lse2
        # masked reduction over the sibling axis (single vectorized sum)
        v0 = jnp.sum(mp0 * g, axis=1)               # [Bt, L, L]
        v1 = jnp.sum(mp1 * g, axis=1)
        q0 = mask_t * jnp.swapaxes(v0, -1, -2)
        q1 = s_span + mask_t * jnp.swapaxes(v1, -1, -2)

    logit0_ref[...] = q0
    logit1_ref[...] = q1
    # marginals = softmax(logits, -1)[..., 1]
    marg_ref[...] = jnp.exp(q1 - lae(q0, q1))


def constituency_lbp(s_span, s_pair, mask, target=None, max_iter=MAX_ITER):
    """JAX/Pallas equivalent of ConstituencyLBP.forward.

    s_span: f32[B, L, L]      span scores
    s_pair: f32[B, L, L, L]   second-order triple scores
    mask:   bool[B, L, L]
    target: optional int/bool[B, L, L]
    Returns marginals (and loss if target is given), matching the PyTorch module.
    """
    B, L, _ = mask.shape
    s_span = s_span.astype(jnp.float32)
    s_pair = s_pair.astype(jnp.float32)
    # The only host-side layout prep is the cheap [B, L, L] mask transpose.
    mask_t = jnp.swapaxes(mask, 1, 2).astype(jnp.float32)

    # Batch-block size: keep the s_pair block (+ temporaries) small in VMEM but
    # keep >= 2 grid steps when possible so both v7x TensorCores get work.
    block_bytes = 4 * L * L * L
    bt = max(1, min((2 * 1024 * 1024) // max(block_bytes, 1), (B + 1) // 2))
    bt = min(bt, B)
    while B % bt:
        bt -= 1

    # Rough VMEM estimate: double-buffered s_pair + ~10 L^3 temporaries per block.
    vmem_est = 12 * bt * block_bytes + 8 * 4 * bt * L * L
    vmem_limit = int(min(64 * 1024 * 1024, max(32 * 1024 * 1024, 2 * vmem_est)))

    spec3 = pl.BlockSpec((bt, L, L), lambda b: (b, 0, 0))
    spec4 = pl.BlockSpec((bt, L, L, L), lambda b: (b, 0, 0, 0))
    out3 = jax.ShapeDtypeStruct((B, L, L), jnp.float32)

    kernel = functools.partial(_lbp_kernel, max_iter=max_iter)
    logit0, logit1, marginals = pl.pallas_call(
        kernel,
        out_shape=(out3, out3, out3),
        grid=(B // bt,),
        in_specs=[spec3, spec4, spec3],
        out_specs=(spec3, spec3, spec3),
        compiler_params=pltpu.CompilerParams(
            dimension_semantics=("parallel",),
            vmem_limit_bytes=vmem_limit,
        ),
    )(s_span, s_pair, mask_t)

    if target is None:
        return marginals

    # F.cross_entropy(logits[mask], target[mask]) over 2 classes, mean reduction,
    # implemented as a masked mean (boolean advanced indexing done as glue).
    lse = jnp.logaddexp(logit0, logit1)
    logp0 = logit0 - lse
    logp1 = logit1 - lse
    tgt = target.astype(jnp.float32)
    nll = -(tgt * logp1 + (1.0 - tgt) * logp0)
    mf = mask.astype(jnp.float32)
    loss = jnp.sum(nll * mf) / jnp.maximum(jnp.sum(mf), 1.0)
    return loss, marginals


def _lbp_reference(s_span, s_pair, mask, max_iter):
    """Literal pure-JAX transcription of the PyTorch ConstituencyLBP.lbp (testing only)."""
    B, L, _ = mask.shape
    idx = jnp.arange(L)
    ii = jnp.broadcast_to(idx[:, None], (L, L))
    jj = jnp.broadcast_to(idx[None, :], (L, L))
    ls, rs = jnp.minimum(ii, jj), jnp.maximum(ii, jj)
    mask_m = jnp.moveaxis(mask, 0, 2)                                   # [L, L, B]
    mask2o = jnp.broadcast_to(mask_m[:, :, None, :], (L, L, L, B))
    mask2o = mask2o & (ls[:, :, None] != idx[None, None, :])[..., None]
    mask2o = mask2o & (rs[:, :, None] != idx[None, None, :])[..., None]
    s_span_p = jnp.transpose(jnp.stack([jnp.zeros_like(s_span), s_span]), (0, 3, 2, 1))
    s_pair_p = jnp.transpose(s_pair, (2, 1, 3, 0))
    q = s_span_p
    m_pair = jnp.zeros((2, L, L, L, B), s_pair.dtype)
    for _ in range(max_iter):
        q = jax.nn.log_softmax(q, axis=0)
        m = q[:, :, :, None, :] - m_pair
        t0 = jax.nn.logsumexp(m, axis=0)
        t1 = jax.nn.logsumexp(jnp.stack([m[0], m[1] + s_pair_p]), axis=0)
        m_pair = jax.nn.log_softmax(jnp.stack([t0, t1]), axis=0)
        q = s_span_p + jnp.sum(jnp.swapaxes(m_pair, 2, 3) * mask2o[None].astype(q.dtype), axis=3)
    return jnp.transpose(q, (3, 2, 1, 0))                               # [B, L, L, 2]


if __name__ == "__main__":
    B, L = 2, 8
    key = jax.random.PRNGKey(0)
    k1, k2, k3 = jax.random.split(key, 3)

    s_span = jax.random.normal(k1, (B, L, L), dtype=jnp.float32)
    s_pair = jax.random.normal(k2, (B, L, L, L), dtype=jnp.float32)

    lengths = jnp.array([8, 6])
    idx = jnp.arange(L)
    tok = idx[None, :] < lengths[:, None]                 # valid tokens per batch
    span_ut = idx[:, None] < idx[None, :]                 # strictly upper-triangular spans
    mask = span_ut[None, :, :] & tok[:, :, None] & tok[:, None, :]
    target = (jax.random.uniform(k3, (B, L, L)) < 0.3).astype(jnp.int32)

    # inference path (target=None) and training path (loss + marginals)
    marginals_only = constituency_lbp(s_span, s_pair, mask)
    loss, marginals = constituency_lbp(s_span, s_pair, mask, target)
    jax.block_until_ready((marginals_only, loss, marginals))

    # numerical sanity check against a literal transcription of the torch code
    logits_ref = _lbp_reference(s_span, s_pair, mask, MAX_ITER)
    marginals_ref = jax.nn.softmax(logits_ref, axis=-1)[..., 1]
    err = float(jnp.max(jnp.abs(marginals_only - marginals_ref)))
    assert err < 1e-3, f"kernel/reference mismatch: max abs err = {err}"

    print("KERNEL_OK")
</pallas_src>

<mosaic_0001>
module attributes {stable_mosaic.version = 11 : i64} {
  func.func @_lbp_kernel(%arg0: i32, %arg1: memref<1x8x8xf32, #tpu.memory_space<vmem>>, %arg2: memref<1x8x8x8xf32, #tpu.memory_space<vmem>>, %arg3: memref<1x8x8xf32, #tpu.memory_space<vmem>>, %arg4: memref<1x8x8xf32, #tpu.memory_space<vmem>>, %arg5: memref<1x8x8xf32, #tpu.memory_space<vmem>>, %arg6: memref<1x8x8xf32, #tpu.memory_space<vmem>>) attributes {dimension_semantics = [#tpu.dimension_semantics<parallel>], iteration_bounds = array<i64: 2>, scalar_prefetch = 0 : i64, scratch_operands = 0 : i64, tpu.core_type = #tpu.core_type<tc>, window_params = [{transform_indices = @transform_0, window_bounds = array<i64: 1, 8, 8>}, {transform_indices = @transform_1, window_bounds = array<i64: 1, 8, 8, 8>}, {transform_indices = @transform_2, window_bounds = array<i64: 1, 8, 8>}, {transform_indices = @transform_3, window_bounds = array<i64: 1, 8, 8>}, {transform_indices = @transform_4, window_bounds = array<i64: 1, 8, 8>}, {transform_indices = @transform_5, window_bounds = array<i64: 1, 8, 8>}]} {
    %c0 = arith.constant 0 : index
    %c0_0 = arith.constant 0 : index
    %c0_1 = arith.constant 0 : index
    %0 = vector.load %arg1[%c0, %c0_0, %c0_1] : memref<1x8x8xf32, #tpu.memory_space<vmem>>, vector<1x8x8xf32>
    %c0_2 = arith.constant 0 : index
    %c0_3 = arith.constant 0 : index
    %c0_4 = arith.constant 0 : index
    %c0_5 = arith.constant 0 : index
    %1 = vector.load %arg2[%c0_2, %c0_3, %c0_4, %c0_5] : memref<1x8x8x8xf32, #tpu.memory_space<vmem>>, vector<1x8x8x8xf32>
    %c0_6 = arith.constant 0 : index
    %c0_7 = arith.constant 0 : index
    %c0_8 = arith.constant 0 : index
    %2 = vector.load %arg3[%c0_6, %c0_7, %c0_8] : memref<1x8x8xf32, #tpu.memory_space<vmem>>, vector<1x8x8xf32>
    %3 = tpu.iota {dimensions = array<i32: 0>} : vector<8x8xi32>
    %4 = tpu.iota {dimensions = array<i32: 1>} : vector<8x8xi32>
    %5 = arith.cmpi ne, %3, %4 : vector<8x8xi32>
    %6 = arith.extui %5 : vector<8x8xi1> to vector<8x8xi32>
    %7 = arith.sitofp %6 : vector<8x8xi32> to vector<8x8xf32>
    %8 = vector.shape_cast %7 : vector<8x8xf32> to vector<8x8x1xf32>
    %9 = vector.shape_cast %7 : vector<8x8xf32> to vector<8x1x8xf32>
    %10 = vector.broadcast %8 : vector<8x8x1xf32> to vector<8x8x8xf32>
    %11 = vector.broadcast %9 : vector<8x1x8xf32> to vector<8x8x8xf32>
    %12 = arith.mulf %10, %11 : vector<8x8x8xf32>
    %13 = vector.shape_cast %12 : vector<8x8x8xf32> to vector<1x8x8x8xf32>
    %cst = arith.constant 0.000000e+00 : f32
    %14 = vector.broadcast %cst : f32 to vector<1x8x8xf32>
    %cst_9 = arith.constant 0.000000e+00 : f32
    %15 = vector.broadcast %cst_9 : f32 to vector<1x8x8x8xf32>
    %cst_10 = arith.constant 0.000000e+00 : f32
    %16 = vector.broadcast %cst_10 : f32 to vector<1x8x8x8xf32>
    %17 = arith.maximumf %14, %0 : vector<1x8x8xf32>
    %18 = arith.subf %14, %0 : vector<1x8x8xf32>
    %19 = math.absf %18 : vector<1x8x8xf32>
    %cst_11 = arith.constant 0.000000e+00 : f32
    %20 = vector.broadcast %cst_11 : f32 to vector<1x8x8xf32>
    %21 = arith.subf %20, %19 : vector<1x8x8xf32>
    %22 = math.exp %21 : vector<1x8x8xf32>
    %cst_12 = arith.constant 1.000000e+00 : f32
    %23 = vector.broadcast %cst_12 : f32 to vector<1x8x8xf32>
    %24 = arith.addf %23, %22 : vector<1x8x8xf32>
    %25 = math.log %24 : vector<1x8x8xf32>
    %26 = arith.addf %17, %25 : vector<1x8x8xf32>
    %27 = arith.subf %14, %26 : vector<1x8x8xf32>
    %28 = arith.subf %0, %26 : vector<1x8x8xf32>
    %29 = vector.shape_cast %27 : vector<1x8x8xf32> to vector<1x8x8x1xf32>
    %30 = vector.broadcast %29 : vector<1x8x8x1xf32> to vector<1x8x8x8xf32>
    %31 = arith.subf %30, %15 : vector<1x8x8x8xf32>
    %32 = vector.shape_cast %28 : vector<1x8x8xf32> to vector<1x8x8x1xf32>
    %33 = vector.broadcast %32 : vector<1x8x8x1xf32> to vector<1x8x8x8xf32>
    %34 = arith.subf %33, %16 : vector<1x8x8x8xf32>
    %35 = arith.maximumf %31, %34 : vector<1x8x8x8xf32>
    %36 = arith.subf %31, %34 : vector<1x8x8x8xf32>
    %37 = math.absf %36 : vector<1x8x8x8xf32>
    %cst_13 = arith.constant 0.000000e+00 : f32
    %38 = vector.broadcast %cst_13 : f32 to vector<1x8x8x8xf32>
    %39 = arith.subf %38, %37 : vector<1x8x8x8xf32>
    %40 = math.exp %39 : vector<1x8x8x8xf32>
    %cst_14 = arith.constant 1.000000e+00 : f32
    %41 = vector.broadcast %cst_14 : f32 to vector<1x8x8x8xf32>
    %42 = arith.addf %41, %40 : vector<1x8x8x8xf32>
    %43 = math.log %42 : vector<1x8x8x8xf32>
    %44 = arith.addf %35, %43 : vector<1x8x8x8xf32>
    %45 = arith.addf %34, %1 : vector<1x8x8x8xf32>
    %46 = arith.maximumf %31, %45 : vector<1x8x8x8xf32>
    %47 = arith.subf %31, %45 : vector<1x8x8x8xf32>
    %48 = math.absf %47 : vector<1x8x8x8xf32>
    %cst_15 = arith.constant 0.000000e+00 : f32
    %49 = vector.broadcast %cst_15 : f32 to vector<1x8x8x8xf32>
    %50 = arith.subf %49, %48 : vector<1x8x8x8xf32>
    %51 = math.exp %50 : vector<1x8x8x8xf32>
    %cst_16 = arith.constant 1.000000e+00 : f32
    %52 = vector.broadcast %cst_16 : f32 to vector<1x8x8x8xf32>
    %53 = arith.addf %52, %51 : vector<1x8x8x8xf32>
    %54 = math.log %53 : vector<1x8x8x8xf32>
    %55 = arith.addf %46, %54 : vector<1x8x8x8xf32>
    %56 = arith.maximumf %44, %55 : vector<1x8x8x8xf32>
    %57 = arith.subf %44, %55 : vector<1x8x8x8xf32>
    %58 = math.absf %57 : vector<1x8x8x8xf32>
    %cst_17 = arith.constant 0.000000e+00 : f32
    %59 = vector.broadcast %cst_17 : f32 to vector<1x8x8x8xf32>
    %60 = arith.subf %59, %58 : vector<1x8x8x8xf32>
    %61 = math.exp %60 : vector<1x8x8x8xf32>
    %cst_18 = arith.constant 1.000000e+00 : f32
    %62 = vector.broadcast %cst_18 : f32 to vector<1x8x8x8xf32>
    %63 = arith.addf %62, %61 : vector<1x8x8x8xf32>
    %64 = math.log %63 : vector<1x8x8x8xf32>
    %65 = arith.addf %56, %64 : vector<1x8x8x8xf32>
    %66 = arith.subf %44, %65 : vector<1x8x8x8xf32>
    %67 = arith.subf %55, %65 : vector<1x8x8x8xf32>
    %68 = arith.mulf %66, %13 : vector<1x8x8x8xf32>
    %cst_19 = arith.constant dense<0.000000e+00> : vector<1x8x8xf32>
    %69 = vector.multi_reduction <add>, %68, %cst_19 [1] : vector<1x8x8x8xf32> to vector<1x8x8xf32>
    %70 = arith.mulf %67, %13 : vector<1x8x8x8xf32>
    %cst_20 = arith.constant dense<0.000000e+00> : vector<1x8x8xf32>
    %71 = vector.multi_reduction <add>, %70, %cst_20 [1] : vector<1x8x8x8xf32> to vector<1x8x8xf32>
    %72 = tpu.transpose %69, [0, 2, 1] : vector<1x8x8xf32> -> vector<1x8x8xf32>
    %73 = arith.mulf %2, %72 : vector<1x8x8xf32>
    %74 = tpu.transpose %71, [0, 2, 1] : vector<1x8x8xf32> -> vector<1x8x8xf32>
    %75 = arith.mulf %2, %74 : vector<1x8x8xf32>
    %76 = arith.addf %0, %75 : vector<1x8x8xf32>
    %77 = arith.maximumf %73, %76 : vector<1x8x8xf32>
    %78 = arith.subf %73, %76 : vector<1x8x8xf32>
    %79 = math.absf %78 : vector<1x8x8xf32>
    %cst_21 = arith.constant 0.000000e+00 : f32
    %80 = vector.broadcast %cst_21 : f32 to vector<1x8x8xf32>
    %81 = arith.subf %80, %79 : vector<1x8x8xf32>
    %82 = math.exp %81 : vector<1x8x8xf32>
    %cst_22 = arith.constant 1.000000e+00 : f32
    %83 = vector.broadcast %cst_22 : f32 to vector<1x8x8xf32>
    %84 = arith.addf %83, %82 : vector<1x8x8xf32>
    %85 = math.log %84 : vector<1x8x8xf32>
    %86 = arith.addf %77, %85 : vector<1x8x8xf32>
    %87 = arith.subf %73, %86 : vector<1x8x8xf32>
    %88 = arith.subf %76, %86 : vector<1x8x8xf32>
    %89 = vector.shape_cast %87 : vector<1x8x8xf32> to vector<1x8x8x1xf32>
    %90 = vector.broadcast %89 : vector<1x8x8x1xf32> to vector<1x8x8x8xf32>
    %91 = arith.subf %90, %66 : vector<1x8x8x8xf32>
    %92 = vector.shape_cast %88 : vector<1x8x8xf32> to vector<1x8x8x1xf32>
    %93 = vector.broadcast %92 : vector<1x8x8x1xf32> to vector<1x8x8x8xf32>
    %94 = arith.subf %93, %67 : vector<1x8x8x8xf32>
    %95 = arith.maximumf %91, %94 : vector<1x8x8x8xf32>
    %96 = arith.subf %91, %94 : vector<1x8x8x8xf32>
    %97 = math.absf %96 : vector<1x8x8x8xf32>
    %cst_23 = arith.constant 0.000000e+00 : f32
    %98 = vector.broadcast %cst_23 : f32 to vector<1x8x8x8xf32>
    %99 = arith.subf %98, %97 : vector<1x8x8x8xf32>
    %100 = math.exp %99 : vector<1x8x8x8xf32>
    %cst_24 = arith.constant 1.000000e+00 : f32
    %101 = vector.broadcast %cst_24 : f32 to vector<1x8x8x8xf32>
    %102 = arith.addf %101, %100 : vector<1x8x8x8xf32>
    %103 = math.log %102 : vector<1x8x8x8xf32>
    %104 = arith.addf %95, %103 : vector<1x8x8x8xf32>
    %105 = arith.addf %94, %1 : vector<1x8x8x8xf32>
    %106 = arith.maximumf %91, %105 : vector<1x8x8x8xf32>
    %107 = arith.subf %91, %105 : vector<1x8x8x8xf32>
    %108 = math.absf %107 : vector<1x8x8x8xf32>
    %cst_25 = arith.constant 0.000000e+00 : f32
    %109 = vector.broadcast %cst_25 : f32 to vector<1x8x8x8xf32>
    %110 = arith.subf %109, %108 : vector<1x8x8x8xf32>
    %111 = math.exp %110 : vector<1x8x8x8xf32>
    %cst_26 = arith.constant 1.000000e+00 : f32
    %112 = vector.broadcast %cst_26 : f32 to vector<1x8x8x8xf32>
    %113 = arith.addf %112, %111 : vector<1x8x8x8xf32>
    %114 = math.log %113 : vector<1x8x8x8xf32>
    %115 = arith.addf %106, %114 : vector<1x8x8x8xf32>
    %116 = arith.maximumf %104, %115 : vector<1x8x8x8xf32>
    %117 = arith.subf %104, %115 : vector<1x8x8x8xf32>
    %118 = math.absf %117 : vector<1x8x8x8xf32>
    %cst_27 = arith.constant 0.000000e+00 : f32
    %119 = vector.broadcast %cst_27 : f32 to vector<1x8x8x8xf32>
    %120 = arith.subf %119, %118 : vector<1x8x8x8xf32>
    %121 = math.exp %120 : vector<1x8x8x8xf32>
    %cst_28 = arith.constant 1.000000e+00 : f32
    %122 = vector.broadcast %cst_28 : f32 to vector<1x8x8x8xf32>
    %123 = arith.addf %122, %121 : vector<1x8x8x8xf32>
    %124 = math.log %123 : vector<1x8x8x8xf32>
    %125 = arith.addf %116, %124 : vector<1x8x8x8xf32>
    %126 = arith.subf %104, %125 : vector<1x8x8x8xf32>
    %127 = arith.subf %115, %125 : vector<1x8x8x8xf32>
    %128 = arith.mulf %126, %13 : vector<1x8x8x8xf32>
    %cst_29 = arith.constant dense<0.000000e+00> : vector<1x8x8xf32>
    %129 = vector.multi_reduction <add>, %128, %cst_29 [1] : vector<1x8x8x8xf32> to vector<1x8x8xf32>
    %130 = arith.mulf %127, %13 : vector<1x8x8x8xf32>
    %cst_30 = arith.constant dense<0.000000e+00> : vector<1x8x8xf32>
    %131 = vector.multi_reduction <add>, %130, %cst_30 [1] : vector<1x8x8x8xf32> to vector<1x8x8xf32>
    %132 = tpu.transpose %129, [0, 2, 1] : vector<1x8x8xf32> -> vector<1x8x8xf32>
    %133 = arith.mulf %2, %132 : vector<1x8x8xf32>
    %134 = tpu.transpose %131, [0, 2, 1] : vector<1x8x8xf32> -> vector<1x8x8xf32>
    %135 = arith.mulf %2, %134 : vector<1x8x8xf32>
    %136 = arith.addf %0, %135 : vector<1x8x8xf32>
    %137 = arith.maximumf %133, %136 : vector<1x8x8xf32>
    %138 = arith.subf %133, %136 : vector<1x8x8xf32>
    %139 = math.absf %138 : vector<1x8x8xf32>
    %cst_31 = arith.constant 0.000000e+00 : f32
    %140 = vector.broadcast %cst_31 : f32 to vector<1x8x8xf32>
    %141 = arith.subf %140, %139 : vector<1x8x8xf32>
    %142 = math.exp %141 : vector<1x8x8xf32>
    %cst_32 = arith.constant 1.000000e+00 : f32
    %143 = vector.broadcast %cst_32 : f32 to vector<1x8x8xf32>
    %144 = arith.addf %143, %142 : vector<1x8x8xf32>
    %145 = math.log %144 : vector<1x8x8xf32>
    %146 = arith.addf %137, %145 : vector<1x8x8xf32>
    %147 = arith.subf %133, %146 : vector<1x8x8xf32>
    %148 = arith.subf %136, %146 : vector<1x8x8xf32>
    %149 = vector.shape_cast %147 : vector<1x8x8xf32> to vector<1x8x8x1xf32>
    %150 = vector.broadcast %149 : vector<1x8x8x1xf32> to vector<1x8x8x8xf32>
    %151 = arith.subf %150, %126 : vector<1x8x8x8xf32>
    %152 = vector.shape_cast %148 : vector<1x8x8xf32> to vector<1x8x8x1xf32>
    %153 = vector.broadcast %152 : vector<1x8x8x1xf32> to vector<1x8x8x8xf32>
    %154 = arith.subf %153, %127 : vector<1x8x8x8xf32>
    %155 = arith.maximumf %151, %154 : vector<1x8x8x8xf32>
    %156 = arith.subf %151, %154 : vector<1x8x8x8xf32>
    %157 = math.absf %156 : vector<1x8x8x8xf32>
    %cst_33 = arith.constant 0.000000e+00 : f32
    %158 = vector.broadcast %cst_33 : f32 to vector<1x8x8x8xf32>
    %159 = arith.subf %158, %157 : vector<1x8x8x8xf32>
    %160 = math.exp %159 : vector<1x8x8x8xf32>
    %cst_34 = arith.constant 1.000000e+00 : f32
    %161 = vector.broadcast %cst_34 : f32 to vector<1x8x8x8xf32>
    %162 = arith.addf %161, %160 : vector<1x8x8x8xf32>
    %163 = math.log %162 : vector<1x8x8x8xf32>
    %164 = arith.addf %155, %163 : vector<1x8x8x8xf32>
    %165 = arith.addf %154, %1 : vector<1x8x8x8xf32>
    %166 = arith.maximumf %151, %165 : vector<1x8x8x8xf32>
    %167 = arith.subf %151, %165 : vector<1x8x8x8xf32>
    %168 = math.absf %167 : vector<1x8x8x8xf32>
    %cst_35 = arith.constant 0.000000e+00 : f32
    %169 = vector.broadcast %cst_35 : f32 to vector<1x8x8x8xf32>
    %170 = arith.subf %169, %168 : vector<1x8x8x8xf32>
    %171 = math.exp %170 : vector<1x8x8x8xf32>
    %cst_36 = arith.constant 1.000000e+00 : f32
    %172 = vector.broadcast %cst_36 : f32 to vector<1x8x8x8xf32>
    %173 = arith.addf %172, %171 : vector<1x8x8x8xf32>
    %174 = math.log %173 : vector<1x8x8x8xf32>
    %175 = arith.addf %166, %174 : vector<1x8x8x8xf32>
    %176 = arith.maximumf %164, %175 : vector<1x8x8x8xf32>
    %177 = arith.subf %164, %175 : vector<1x8x8x8xf32>
    %178 = math.absf %177 : vector<1x8x8x8xf32>
    %cst_37 = arith.constant 0.000000e+00 : f32
    %179 = vector.broadcast %cst_37 : f32 to vector<1x8x8x8xf32>
    %180 = arith.subf %179, %178 : vector<1x8x8x8xf32>
    %181 = math.exp %180 : vector<1x8x8x8xf32>
    %cst_38 = arith.constant 1.000000e+00 : f32
    %182 = vector.broadcast %cst_38 : f32 to vector<1x8x8x8xf32>
    %183 = arith.addf %182, %181 : vector<1x8x8x8xf32>
    %184 = math.log %183 : vector<1x8x8x8xf32>
    %185 = arith.addf %176, %184 : vector<1x8x8x8xf32>
    %186 = arith.subf %164, %185 : vector<1x8x8x8xf32>
    %187 = arith.subf %175, %185 : vector<1x8x8x8xf32>
    %188 = arith.mulf %186, %13 : vector<1x8x8x8xf32>
    %cst_39 = arith.constant dense<0.000000e+00> : vector<1x8x8xf32>
    %189 = vector.multi_reduction <add>, %188, %cst_39 [1] : vector<1x8x8x8xf32> to vector<1x8x8xf32>
    %190 = arith.mulf %187, %13 : vector<1x8x8x8xf32>
    %cst_40 = arith.constant dense<0.000000e+00> : vector<1x8x8xf32>
    %191 = vector.multi_reduction <add>, %190, %cst_40 [1] : vector<1x8x8x8xf32> to vector<1x8x8xf32>
    %192 = tpu.transpose %189, [0, 2, 1] : vector<1x8x8xf32> -> vector<1x8x8xf32>
    %193 = arith.mulf %2, %192 : vector<1x8x8xf32>
    %194 = tpu.transpose %191, [0, 2, 1] : vector<1x8x8xf32> -> vector<1x8x8xf32>
    %195 = arith.mulf %2, %194 : vector<1x8x8xf32>
    %196 = arith.addf %0, %195 : vector<1x8x8xf32>
    %c0_41 = arith.constant 0 : index
    %c0_42 = arith.constant 0 : index
    %c0_43 = arith.constant 0 : index
    %197 = vector.load %arg4[%c0_41, %c0_42, %c0_43] : memref<1x8x8xf32, #tpu.memory_space<vmem>>, vector<1x8x8xf32>
    tpu.vector_store %arg4[%c0_41, %c0_42, %c0_43], %193 {strides = array<i32>} : memref<1x8x8xf32, #tpu.memory_space<vmem>>, vector<1x8x8xf32>,
    %c0_44 = arith.constant 0 : index
    %c0_45 = arith.constant 0 : index
    %c0_46 = arith.constant 0 : index
    %198 = vector.load %arg5[%c0_44, %c0_45, %c0_46] : memref<1x8x8xf32, #tpu.memory_space<vmem>>, vector<1x8x8xf32>
    tpu.vector_store %arg5[%c0_44, %c0_45, %c0_46], %196 {strides = array<i32>} : memref<1x8x8xf32, #tpu.memory_space<vmem>>, vector<1x8x8xf32>,
    %199 = arith.maximumf %193, %196 : vector<1x8x8xf32>
    %200 = arith.subf %193, %196 : vector<1x8x8xf32>
    %201 = math.absf %200 : vector<1x8x8xf32>
    %cst_47 = arith.constant 0.000000e+00 : f32
    %202 = vector.broadcast %cst_47 : f32 to vector<1x8x8xf32>
    %203 = arith.subf %202, %201 : vector<1x8x8xf32>
    %204 = math.exp %203 : vector<1x8x8xf32>
    %cst_48 = arith.constant 1.000000e+00 : f32
    %205 = vector.broadcast %cst_48 : f32 to vector<1x8x8xf32>
    %206 = arith.addf %205, %204 : vector<1x8x8xf32>
    %207 = math.log %206 : vector<1x8x8xf32>
    %208 = arith.addf %199, %207 : vector<1x8x8xf32>
    %209 = arith.subf %196, %208 : vector<1x8x8xf32>
    %210 = math.exp %209 : vector<1x8x8xf32>
    %c0_49 = arith.constant 0 : index
    %c0_50 = arith.constant 0 : index
    %c0_51 = arith.constant 0 : index
    %211 = vector.load %arg6[%c0_49, %c0_50, %c0_51] : memref<1x8x8xf32, #tpu.memory_space<vmem>>, vector<1x8x8xf32>
    tpu.vector_store %arg6[%c0_49, %c0_50, %c0_51], %210 {strides = array<i32>} : memref<1x8x8xf32, #tpu.memory_space<vmem>>, vector<1x8x8xf32>,
    return
  }
  func.func @transform_0(%arg0: i32) -> (i32, i32, i32) {
    %c0_i32 = arith.constant 0 : i32
    %c0_i32_0 = arith.constant 0 : i32
    %c0_i32_1 = arith.constant 0 : i32
    return %arg0, %c0_i32, %c0_i32_0 : i32, i32, i32
  }
  func.func @transform_1(%arg0: i32) -> (i32, i32, i32, i32) {
    %c0_i32 = arith.constant 0 : i32
    %c0_i32_0 = arith.constant 0 : i32
    %c0_i32_1 = arith.constant 0 : i32
    %c0_i32_2 = arith.constant 0 : i32
    return %arg0, %c0_i32, %c0_i32_0, %c0_i32_1 : i32, i32, i32, i32
  }
  func.func @transform_2(%arg0: i32) -> (i32, i32, i32) {
    %c0_i32 = arith.constant 0 : i32
    %c0_i32_0 = arith.constant 0 : i32
    %c0_i32_1 = arith.constant 0 : i32
    return %arg0, %c0_i32, %c0_i32_0 : i32, i32, i32
  }
  func.func @transform_3(%arg0: i32) -> (i32, i32, i32) {
    %c0_i32 = arith.constant 0 : i32
    %c0_i32_0 = arith.constant 0 : i32
    %c0_i32_1 = arith.constant 0 : i32
    return %arg0, %c0_i32, %c0_i32_0 : i32, i32, i32
  }
  func.func @transform_4(%arg0: i32) -> (i32, i32, i32) {
    %c0_i32 = arith.constant 0 : i32
    %c0_i32_0 = arith.constant 0 : i32
    %c0_i32_1 = arith.constant 0 : i32
    return %arg0, %c0_i32, %c0_i32_0 : i32, i32, i32
  }
  func.func @transform_5(%arg0: i32) -> (i32, i32, i32) {
    %c0_i32 = arith.constant 0 : i32
    %c0_i32_0 = arith.constant 0 : i32
    %c0_i32_1 = arith.constant 0 : i32
    return %arg0, %c0_i32, %c0_i32_0 : i32, i32, i32
  }
}

</mosaic_0001>

<bundles_post_ra>
// kernel: tpu_custom_call.1
= control target key start
LH: loop header
LB: loop body
LE: loop exit
PB: predicated region body
PF: predicated region fallthrough
CT: control target
= control target key end

     0   :  { %s4301_s0 = inlined_call_operand.hbm [shape: f32[2,8,8], index: 0, kind: input, shape index: {}]   ;;  %s4302_s1 = inlined_call_operand.hbm [shape: f32[2,8,8,8], index: 1, kind: input, shape index: {}]   ;;  %s4303_s2 = inlined_call_operand.hbm [shape: f32[2,8,8], index: 2, kind: input, shape index: {}]   ;;  %s4304_s3 = inlined_call_operand.hbm [shape: f32[2,8,8], index: 3, kind: output, shape index: {0}]   ;;  %s4305_s4 = inlined_call_operand.hbm [shape: f32[2,8,8], index: 4, kind: output, shape index: {1}]   ;;  %s4306_s5 = inlined_call_operand.hbm [shape: f32[2,8,8], index: 5, kind: output, shape index: {2}]  }
   0x1   :  { %4318 = sst [smem:[#allocation19_spill]] %s4302_s1 }
   0x2   :  { %11 = vsyncpa [#allocation3], 0 }
   0x3   :  { %13 = vsyncpa [#allocation3 + $0x1], 0 }
   0x4   :  { %14 = vsyncpa [#allocation6], 0 }
   0x5   :  { %16 = vsyncpa [#allocation6 + $0x1], 0 }
   0x6   :  { %17 = vsyncpa [#allocation4], 0 }
   0x7   :  { %19 = vsyncpa [#allocation4 + $0x1], 0 }
   0x8   :  { %20 = vsyncpa [#allocation10], 0 }
   0x9   :  { %22 = vsyncpa [#allocation10 + $0x1], 0  ;;  %s2954_s18 = smov 0   ;;  %s2956_s19 = smov 0  }
   0xa   :  { %s2958_s20 = smov 0   ;;  %s2960_s21 = smov 0  }
   0xb LB: > { %s2975_s22 = sadd.s32 4294967295, %s2912_s21   ;;  %s4309_s23 = sadd.s32 4294967294, %s2912_s21   ;;  %s2912_s21 = sphi %s2960_s21, %s4346_s21   ;;  %s2908_s20 = sphi %s2958_s20, %s4345_s20   ;;  %s2904_s19 = sphi %s2956_s19, %s4344_s19   ;;  %s2900_s18 = sphi %s2954_s18, %s4343_s18  }
   0xc   : > { %s2979_s24 = sadd.s32 1, %s2912_s21   ;;  %s35_s25 = sadd.s32 1, %s2908_s20 }
   0xd   : > { %s32_s26 = ssub.s32 %s2912_s21, %s2979_s24  ;;  %p42_p0 = scmp.ne.s32.totalorder %s2908_s20, %s2904_s19 }
   0xe   : > { %p33_p1 = scmp.eq.s32.totalorder %s32_s26, 0  ;;  %p43_p2 = scmp.eq.s32.totalorder %s2912_s21, 0 }
   0xf   : > { %p48_p3 = scmp.ne.s32.totalorder %s2904_s19, %s2900_s18  ;;  %p49_p4 = scmp.eq.s32.totalorder %s2975_s22, 0 }
  0x10   : > { %s2991_s27 = scalar_select %p33_p1, %s2908_s20, %s35_s25  }
  0x11   : > { %p44_p5 = por %p43_p2, %p42_p0  ;;  %p2993_p6 = por %p49_p4, %p48_p3 }
  0x12   : > { %4319 = sst [smem:[#allocation16_spill]] %s2991_s27  ;;  %p124_p7 = scmp.eq.s32.totalorder %s2975_s22, 1 }
  0x13   : > { %s4320_s28 = scalar_select %p2993_p6, 1, 0 }
  0x14   : > { %p130_p8 = scmp.eq.s32.totalorder %s4309_s23, 1  ;;  %p2338_p10 = scmp.lt.s32.totalorder %s2912_s21, 2 }
  0x15   : > { %p3002_p11 = por %p124_p7, %p42_p0  ;;  %s3011_s6 = sand.u32 1, %s2908_s20  }
  0x16   : > { %p3006_p12 = por %p130_p8, %p48_p3  ;;  %p3013_p13 = pnand %p2338_p10, %p44_p5 }
  0x17   : > { %s4321_s29 = scalar_select %p3002_p11, 1, 0 }
  0x18   : > { %s4322_s30 = scalar_select %p3006_p12, 1, 0 }
  0x19   : > { %s4323_s7 = scalar_select %p3013_p13, 1, 0 }
  0x1a   : > { %s220_s8 = sand.u32 1, %s2912_s21   ;;  %s2284_s9 = sshll.u32 %s3011_s6, 6 }
  0x1b   : > { %s2305_s10 = sshll.u32 %s2912_s21, 10  ;;  %s4324_s1 = sld [smem:[#allocation19_spill]] }
  0x1c   : > { %s224_s14 = scalar_lea.vmem [#allocation5], %s2284_s9  ;;  %s3028_s16 = scalar_lea.sflag [#allocation6], %s220_s8 }
  0x1d   : > { %s231_s15 = sshll.u32 %s224_s14, 4  ;;  %p3034_p2 = pneg %p3013_p13  ;;  %s3025_s15 = int_to_ptr.vmem [resolvable:$true] %s231_s15 }
  0x21   : > { %s3023_s13 = scalar_lea.hbm %s4324_s1, %s2305_s10  ;;  %s2697_s9 = scalar_lea.hbm %s4324_s1, 2048 }
  0x22   : > { %s2692_s17 = scalar_lea.hbm %s3023_s13, 1024  ;;  %p2698_p5 = scmp.lt.u32.totalorder %s3023_s13, %s4324_s1 }
  0x23   : > { %p2693_p1 = scmp.ne.s32.totalorder %s3023_s13, %s2692_s17  ;;  %p2699_p7 = scmp.lt.u32.totalorder %s2697_s9, %s2692_s17 }
  0x24   : > { %p2701_p10 = scmp.lt.u32.totalorder %s2692_s17, %s3023_s13 }
  0x25   : > { %p2695_p3 = pnand %p3034_p2, %p2693_p1  ;;  %p2700_p8 = por %p2699_p7, %p2698_p5 }
  0x27   : > { %p2696_p4 = pneg %p2695_p3  ;;  %p2702_p9 = por %p2701_p10, %p2700_p8 }
  0x29   : > { %p2703_p0 = pnand %p2702_p9, %p2696_p4 }
  0x2b   : > { %2706 = shalt.err (!%p2703_p0)
}
  0x2c   : > { %s2707_s8 = scalar_lea.vmem %s3025_s15, 1024  ;;  %s2914_s14 = smov [#allocation5]  }
  0x2d   : > { %p2708_p1 = scmp.ne.s32.totalorder %s3025_s15, %s2707_s8  ;;  %s2712_s26 = sshll.u32 %s2914_s14, 4  ;;  %s2713_s26 = int_to_ptr.vmem [resolvable:$false] %s2712_s26 }
  0x2e   : > { %s2714_s10 = scalar_lea.vmem %s2713_s26, 2048  ;;  %p2715_p11 = scmp.lt.s32.totalorder %s3025_s15, %s2713_s26 }
  0x2f   : > { %p2710_p3 = pnand %p2708_p1, %p3034_p2  ;;  %p2716_p6 = scmp.lt.s32.totalorder %s2714_s10, %s2707_s8 }
  0x31   : > { %p2711_p12 = pneg %p2710_p3  ;;  %p2717_p5 = por %p2716_p6, %p2715_p11 }
  0x33   : > { %p2718_p7 = pnand %p2717_p5, %p2711_p12 }
  0x35   : > { %2721 = shalt.err (!%p2718_p7)
}
  0x36   : > { %s2915_s17 = smov 128   ;;  %s2916_s9 = smov 8  }
  0x37   : > { %2324 = dma.hbm_to_vmem [thread:$0]  (!%p3013_p13), %s3023_s13, 1024, %s3025_s15, %s3028_s16, %s2915_s17, %s2915_s17, %s2916_s9  }
  0x38   : > { %p257_p9 = scmp.lt.s32.totalorder %s2912_s21, 3  ;;  %s4311_s11 = sshll.u32 %s3011_s6, 3 }
  0x39   : > { %s4310_s12 = sshll.u32 %s2912_s21, 7  ;;  %p4326_p6 = scmp.ge.s32.totalorder %s2912_s21, 1 }
  0x3a   : > { %s3072_s10 = scalar_lea.hbm %s4301_s0, %s4310_s12  ;;  %s206_s13 = scalar_lea.vmem [#allocation2], %s4311_s11 }
  0x3b   : > { %p3063_p11 = pnand %p4326_p6, %p257_p9  ;;  %s213_s15 = sshll.u32 %s206_s13, 4  ;;  %s214_s15 = int_to_ptr.vmem [resolvable:$true] %s213_s15 }
  0x3c   : > { %s203_s17 = scalar_lea.sflag [#allocation3], %s3011_s6  ;;  %s2722_s9 = scalar_lea.hbm %s3072_s10, 128 }
  0x3d   : > { %s4327_s8 = scalar_select %p3063_p11, 1, 0 }
  0x3e   : > { %p2723_p12 = scmp.ne.s32.totalorder %s3072_s10, %s2722_s9  ;;  %s2727_s14 = scalar_lea.hbm %s4301_s0, 256 }
  0x3f   : > { %p2728_p8 = scmp.lt.u32.totalorder %s3072_s10, %s4301_s0  ;;  %p2729_p10 = scmp.lt.u32.totalorder %s2727_s14, %s2722_s9 }
  0x40   : > { %p2725_p0 = pnand %p2723_p12, %p3034_p2  ;;  %p2731_p3 = scmp.lt.u32.totalorder %s2722_s9, %s3072_s10 }
  0x41   : > { %p2730_p1 = por %p2729_p10, %p2728_p8 }
  0x42   : > { %p2726_p4 = pneg %p2725_p0 }
  0x43   : > { %p2732_p5 = por %p2731_p3, %p2730_p1 }
  0x45   : > { %p2733_p7 = pnand %p2732_p5, %p2726_p4 }
  0x47   : > { %2736 = shalt.err (!%p2733_p7)
}
  0x48   : > { %s2737_s13 = scalar_lea.vmem %s214_s15, 128  ;;  %s2917_s11 = smov [#allocation2]  }
  0x49   : > { %p2738_p9 = scmp.ne.s32.totalorder %s214_s15, %s2737_s13  ;;  %s2742_s27 = sshll.u32 %s2917_s11, 4  ;;  %s2743_s27 = int_to_ptr.vmem [resolvable:$false] %s2742_s27 }
  0x4a   : > { %s2744_s1 = scalar_lea.vmem %s2743_s27, 256  ;;  %p2745_p0 = scmp.lt.s32.totalorder %s214_s15, %s2743_s27 }
  0x4b   : > { %p2740_p6 = pnand %p2738_p9, %p3034_p2  ;;  %p2746_p11 = scmp.lt.s32.totalorder %s2744_s1, %s2737_s13 }
  0x4d   : > { %p2741_p12 = pneg %p2740_p6  ;;  %p2747_p13 = por %p2746_p11, %p2745_p0 }
  0x4f   : > { %p2748_p8 = pnand %p2747_p13, %p2741_p12 }
  0x51   : > { %2751 = shalt.err (!%p2748_p8)
}
  0x52   : > { %p4328_p10 = scmp.ne.s32.totalorder %s4323_s7, 0  ;;  %s4329_s23 = sshll.u32 %s2912_s21, 7 }
  0x53   : > { %s3099_s14 = scalar_lea.hbm %s4303_s2, %s4329_s23  ;;  %s4330_s11 = sshll.u32 %s3011_s6, 3 }
  0x54   : > { %2321 = dma.hbm_to_vmem [thread:$0]  (!%p4328_p10), %s3072_s10, 128, %s214_s15, %s203_s17  }
  0x55   : > { %s245_s27 = scalar_lea.vmem [#allocation7], %s4330_s11  ;;  %s2752_s13 = scalar_lea.hbm %s3099_s14, 128 }
  0x56   : > { %s252_s26 = sshll.u32 %s245_s27, 4  ;;  %p2753_p13 = scmp.ne.s32.totalorder %s3099_s14, %s2752_s13  ;;  %s253_s26 = int_to_ptr.vmem [resolvable:$true] %s252_s26 }
  0x57   : > { %s2757_s17 = scalar_lea.hbm %s4303_s2, 256  ;;  %p2758_p1 = scmp.lt.u32.totalorder %s3099_s14, %s4303_s2 }
  0x58   : > { %p2755_p11 = pnand %p2753_p13, %p3034_p2  ;;  %p2759_p3 = scmp.lt.u32.totalorder %s2757_s17, %s2752_s13 }
  0x59   : > { %p2761_p7 = scmp.lt.u32.totalorder %s2752_s13, %s3099_s14 }
  0x5a   : > { %p2756_p4 = pneg %p2755_p11  ;;  %p2760_p5 = por %p2759_p3, %p2758_p1 }
  0x5c   : > { %p2762_p9 = por %p2761_p7, %p2760_p5 }
  0x5e   : > { %p2763_p6 = pnand %p2762_p9, %p2756_p4 }
  0x60   : > { %2766 = shalt.err (!%p2763_p6)
}
  0x61   : > { %s2767_s6 = scalar_lea.vmem %s253_s26, 128  ;;  %s2918_s12 = smov [#allocation7]  }
  0x62   : > { %p2768_p12 = scmp.ne.s32.totalorder %s253_s26, %s2767_s6  ;;  %s2772_s9 = sshll.u32 %s2918_s12, 4  ;;  %s2773_s9 = int_to_ptr.vmem [resolvable:$false] %s2772_s9 }
  0x63   : > { %s2774_s11 = scalar_lea.vmem %s2773_s9, 256  ;;  %p2775_p13 = scmp.lt.s32.totalorder %s253_s26, %s2773_s9 }
  0x64   : > { %p2770_p0 = pnand %p2768_p12, %p3034_p2  ;;  %p2776_p11 = scmp.lt.s32.totalorder %s2774_s11, %s2767_s6 }
  0x66   : > { %p2771_p8 = pneg %p2770_p0  ;;  %p2777_p10 = por %p2776_p11, %p2775_p13 }
  0x68   : > { %p2778_p1 = pnand %p2777_p10, %p2771_p8 }
  0x6a   : > { %2781 = shalt.err (!%p2778_p1)
}
  0x6b   : > { %p4331_p3 = scmp.ne.s32.totalorder %s4323_s7, 0  ;;  %p4332_p4 = scmp.ne.s32.totalorder %s4327_s8, 0 }
  0x6d   : > { %2327 = dma.hbm_to_vmem [thread:$0]  (!%p4331_p3), %s3099_s14, 128, %s253_s26, %s3028_s16  }
  0x6e   : > { %261 = sbr.rel (%p4332_p4) target bundleno = 1459 (0x5b3), region = 32 }
  0x75   : > { %s3124_s25 = sand.u32 1, %s2904_s19   ;;  %p4333_p2 = scmp.ne.s32.totalorder %s4320_s28, 0 }
  0x76   : > { %s3127_s27 = sshll.u32 %s3124_s25, 3  ;;  %s264_s13 = scalar_lea.sflag [#allocation3], %s3124_s25 }
  0x77   : > { %s267_s10 = scalar_lea.vmem [#allocation2], %s3127_s27 }
  0x78   : > { %2883 = dma.done.wait (%p4333_p2), %s264_s13, 128  }
  0x79   : > { %2885 = vsyncadd (%p4333_p2), %s264_s13, 4294967168  ;;  %s272_s7 = sand.u32 1, %s2975_s22   ;;  %s2291_s16 = sshll.u32 %s3124_s25, 6 }
  0x7a   : > { %s273_s8 = scalar_lea.sflag [#allocation6], %s272_s7  ;;  %s3139_s14 = scalar_lea.vmem [#allocation5], %s2291_s16 }
  0x7b   : > { %2887 = dma.done.wait (%p4333_p2), %s273_s8, 1152  }
  0x7c   : > { %2889 = vsyncadd (%p4333_p2), %s273_s8, 4294966144  ;;  %v3147_v0 = vld [vmem:[%s267_s10] sm:$0xff]  ;;  %v342_v7 = vlaneseq  ;;  %v2919_v40 = vmov 0.0   ;;  %v3214_v50 = vld [vmem:[%s3139_s14] sm:$0xff]  ;;  %vm899_vm1 = vcmask 64512   ;;  %s285_s28 = scalar_lea.vmem [#allocation7], %s3127_s27 }
  0x7d   : > { %v504_v1 = vsub.f32 0.0, %v3147_v0  ;;  %v503_v9 = vmax.f32 %v3147_v0, 0.0  ;;  %v3227_v55 = vld [vmem:[%s3139_s14 + $0x8] sm:$0xff]  ;;  %s4161_s26 = sshll.u32 %s2975_s22, 7  ;;  %s317_s15 = scalar_lea.vmem [#allocation8], %s3127_s27 }
  0x7e   : > { %v3150_v8 = vshrl.u32 %v342_v7, 7  ;;  %v345_v34 = vand.u32 127, %v342_v7  ;;  %s2079_s17 = sshll.u32 %s317_s15, 4  ;;  %s324_s1 = scalar_lea.vmem [#allocation9], %s3127_s27  ;;  %s4177_s17 = int_to_ptr.vmem [resolvable:$true] %s2079_s17 }
  0x7f   : > { %v505_v2 = vand.u32 2147483647, %v504_v1  ;;  %v3242_v1 = vld [vmem:[%s3139_s14 + $0x10] sm:$0xff]  ;;  %s2092_s23 = sshll.u32 %s324_s1, 4  ;;  %s4175_s9 = scalar_lea.hbm %s4304_s3, %s4161_s26  ;;  %s4188_s23 = int_to_ptr.vmem [resolvable:$true] %s2092_s23 }
  0x80   : > { %v3154_v12 = vsub.s32 0, %v3150_v8  ;;  %v3158_v16 = vsub.s32 1, %v3150_v8  ;;  %v3165_v21 = vsub.s32 2, %v3150_v8  ;;  %v3170_v24 = vsub.s32 3, %v3150_v8  ;;  %s2056_s16 = scalar_lea.sflag [#allocation4], %s3124_s25  ;;  %s2782_s8 = scalar_lea.vmem %s4177_s17, 128 }
  0x81   : > { %v506_v3 = vsub.f32 0.0, %v505_v2  ;;  %v3175_v27 = vsub.s32 4, %v3150_v8  ;;  %v3180_v30 = vsub.s32 5, %v3150_v8  ;;  %v3185_v33 = vsub.s32 6, %v3150_v8  ;;  %p2783_p10 = scmp.ne.s32.totalorder %s4177_s17, %s2782_s8  ;;  %p4338_p5 = scmp.ne.s32.totalorder %s4321_s29, 0 }
  0x82   : > { %v3190_v37 = vsub.s32 7, %v3150_v8  ;;  %vm346_vm0 = vcmp.ne.s32.totalorder %v3150_v8, %v345_v34 }
  0x83   : > { %v507_v4 = vmul.f32 1.442695, %v506_v3  ;;  %v3195_v41 = vsel %vm346_vm0, 1.0, %v2919_v40  ;;  %p2784_p7 = pnand %p2783_p10, %p4338_p5 }
  0x84   : > { %v352_v42 = vrot.slane %v3195_v41, %v3154_v12  ;;  %v359_v43 = vrot.slane %v3195_v41, %v3158_v16  ;;  %v366_v44 = vrot.slane %v3195_v41, %v3165_v21  ;;  %v373_v45 = vrot.slane %v3195_v41, %v3170_v24 }
  0x85   : > { %2376 = vpow2.f32 %v507_v4  ;;  %v380_v46 = vrot.slane %v3195_v41, %v3175_v27  ;;  %v387_v47 = vrot.slane %v3195_v41, %v3180_v30  ;;  %v394_v48 = vrot.slane %v3195_v41, %v3185_v33  ;;  %p2785_p9 = pneg %p2784_p7 }
  0x86   : > { %v401_v49 = vrot.slane %v3195_v41, %v3190_v37 }
  0x8f   : > { %v2377_v5 = vpop.eup %2376 }
  0x90   : > { %v509_v6 = vadd.f32 1.0, %v2377_v5 }
  0x92   : > { %2378 = vlog2.f32 %v509_v6 }
  0x9c   : > { %v2379_v10 = vpop.eup %2378 }
  0x9d   : > { %v511_v11 = vmul.f32 0.6931472, %v2379_v10 }
  0x9f   : > { %v512_v13 = vadd.f32 %v511_v11, %v503_v9 }
  0xa1   : > { %v514_v14 = vsub.f32 %v3147_v0, %v512_v13  ;;  %v513_v15 = vsub.f32 0.0, %v512_v13 }
  0xa3   : > { %v574_v17 = vrot.slane %v514_v14, %v3154_v12  ;;  %v518_v18 = vrot.slane %v513_v15, %v3154_v12  ;;  %v581_v19 = vrot.slane %v514_v14, %v3158_v16  ;;  %v525_v20 = vrot.slane %v513_v15, %v3158_v16 }
  0xa4   : > { %v588_v22 = vrot.slane %v514_v14, %v3165_v21  ;;  %v532_v23 = vrot.slane %v513_v15, %v3165_v21  ;;  %v595_v25 = vrot.slane %v514_v14, %v3170_v24  ;;  %v539_v26 = vrot.slane %v513_v15, %v3170_v24 }
  0xa5   : > { %576 = vbcast.lane.b32.xlu0 %v574_v17, 256  ;;  %520 = vbcast.lane.b32.xlu1 %v518_v18, 256  ;;  %v602_v28 = vrot.slane %v514_v14, %v3175_v27  ;;  %v546_v29 = vrot.slane %v513_v15, %v3175_v27  ;;  %v609_v31 = vrot.slane %v514_v14, %v3180_v30 }
  0xa6   : > { %v553_v32 = vrot.slane %v513_v15, %v3180_v30  ;;  %v616_v35 = vrot.slane %v514_v14, %v3185_v33  ;;  %v560_v36 = vrot.slane %v513_v15, %v3185_v33  ;;  %v623_v38 = vrot.slane %v514_v14, %v3190_v37 }
  0xa7   : > { %v567_v39 = vrot.slane %v513_v15, %v3190_v37  ;;  %v3257_v15 = vld [vmem:[%s3139_s14 + $0x18] sm:$0xff] }
  0xa9   : > { %583 = vbcast.lane.b32.xlu0 %v581_v19, 256  ;;  %527 = vbcast.lane.b32.xlu1 %v525_v20, 256 }
  0xad   : > { %590 = vbcast.lane.b32.xlu0 %v588_v22, 256  ;;  %534 = vbcast.lane.b32.xlu1 %v532_v23, 256 }
  0xb1   : > { %597 = vbcast.lane.b32.xlu0 %v595_v25, 256  ;;  %541 = vbcast.lane.b32.xlu1 %v539_v26, 256 }
  0xb5   : > { %604 = vbcast.lane.b32.xlu0 %v602_v28, 256  ;;  %548 = vbcast.lane.b32.xlu1 %v546_v29, 256 }
  0xb9   : > { %611 = vbcast.lane.b32.xlu0 %v609_v31, 256  ;;  %555 = vbcast.lane.b32.xlu1 %v553_v32, 256  ;;  %v3272_v32 = vld [vmem:[%s3139_s14 + $0x20] sm:$0xff] }
  0xbd   : > { %618 = vbcast.lane.b32.xlu0 %v616_v35, 256  ;;  %562 = vbcast.lane.b32.xlu1 %v560_v36, 256 }
  0xc1   : > { %625 = vbcast.lane.b32.xlu0 %v623_v38, 256  ;;  %569 = vbcast.lane.b32.xlu1 %v567_v39, 256 }
  0xc5   : > { %354 = vbcast.lane.b32.xlu0 %v352_v42, 256  ;;  %361 = vbcast.lane.b32.xlu1 %v359_v43, 256 }
  0xc9   : > { %368 = vbcast.lane.b32.xlu0 %v366_v44, 256  ;;  %375 = vbcast.lane.b32.xlu1 %v373_v45, 256 }
  0xcd   : > { %382 = vbcast.lane.b32.xlu0 %v380_v46, 256  ;;  %389 = vbcast.lane.b32.xlu1 %v387_v47, 256  ;;  %v3287_v47 = vld [vmem:[%s3139_s14 + $0x28] sm:$0xff] }
  0xd1   : > { %396 = vbcast.lane.b32.xlu0 %v394_v48, 256  ;;  %403 = vbcast.lane.b32.xlu1 %v401_v49, 256 }
 0x117   : > { %v3216_v51 = vpop.permute.xlu0 %576  ;;  %v3218_v52 = vpop.permute.xlu1 %520 }
 0x118   : > { %v3222_v53 = vadd.f32 %v3216_v51, %v3214_v50  ;;  %v635_v54 = vsub.f32 %v3218_v52, %v3216_v51 }
 0x11a   : > { %v643_v56 = vand.u32 2147483647, %v635_v54  ;;  %v723_v57 = vsub.f32 %v3218_v52, %v3222_v53 }
 0x11b   : > { %v3231_v58 = vpop.permute.xlu0 %583  ;;  %v3233_v59 = vpop.permute.xlu1 %527 }
 0x11c   : > { %v651_v60 = vsub.f32 0.0, %v643_v56  ;;  %v731_v61 = vand.u32 2147483647, %v723_v57  ;;  %v3237_v62 = vadd.f32 %v3231_v58, %v3227_v55  ;;  %v636_v63 = vsub.f32 %v3233_v59, %v3231_v58 }
 0x11e   : > { %v659_v2 = vmul.f32 1.442695, %v651_v60  ;;  %v739_v3 = vsub.f32 0.0, %v731_v61  ;;  %v724_v4 = vsub.f32 %v3233_v59, %v3237_v62  ;;  %v644_v5 = vand.u32 2147483647, %v636_v63 }
 0x11f   : > { %v3246_v6 = vpop.permute.xlu0 %590  ;;  %v3248_v7 = vpop.permute.xlu1 %534 }
 0x120   : > { %2380 = vpow2.f32 %v659_v2  ;;  %v747_v9 = vmul.f32 1.442695, %v739_v3  ;;  %v732_v10 = vand.u32 2147483647, %v724_v4  ;;  %v3252_v11 = vadd.f32 %v3246_v6, %v3242_v1 }
 0x121   : > { %v652_v13 = vsub.f32 0.0, %v644_v5  ;;  %v637_v14 = vsub.f32 %v3248_v7, %v3246_v6 }
 0x122   : > { %2382 = vpow2.f32 %v747_v9  ;;  %v740_v17 = vsub.f32 0.0, %v732_v10  ;;  %v725_v18 = vsub.f32 %v3248_v7, %v3252_v11 }
 0x123   : > { %v661_v19 = vmul.f32 1.442695, %v652_v13  ;;  %v645_v20 = vand.u32 2147483647, %v637_v14  ;;  %v3261_v22 = vpop.permute.xlu0 %597  ;;  %v3263_v23 = vpop.permute.xlu1 %541 }
 0x124   : > { %v749_v25 = vmul.f32 1.442695, %v740_v17  ;;  %v733_v26 = vand.u32 2147483647, %v725_v18  ;;  %v3267_v28 = vadd.f32 %v3261_v22, %v3257_v15  ;;  %v638_v31 = vsub.f32 %v3263_v23, %v3261_v22  ;;  %v3304_v18 = vld [vmem:[%s3139_s14 + $0x30] sm:$0xff] }
 0x125   : > { %2384 = vpow2.f32 %v661_v19  ;;  %v653_v29 = vsub.f32 0.0, %v645_v20 }
 0x126   : > { %2386 = vpow2.f32 %v749_v25  ;;  %v741_v34 = vsub.f32 0.0, %v733_v26  ;;  %v726_v35 = vsub.f32 %v3263_v23, %v3267_v28  ;;  %v646_v38 = vand.u32 2147483647, %v638_v31 }
 0x127   : > { %v663_v36 = vmul.f32 1.442695, %v653_v29  ;;  %v3276_v39 = vpop.permute.xlu0 %604  ;;  %v3278_v40 = vpop.permute.xlu1 %548 }
 0x128   : > { %v751_v42 = vmul.f32 1.442695, %v741_v34  ;;  %v734_v43 = vand.u32 2147483647, %v726_v35  ;;  %v3282_v44 = vadd.f32 %v3276_v39, %v3272_v32  ;;  %v654_v45 = vsub.f32 0.0, %v646_v38 }
 0x129   : > { %2388 = vpow2.f32 %v663_v36  ;;  %v639_v46 = vsub.f32 %v3278_v40, %v3276_v39 }
 0x12a   : > { %v2381_v48 = vpop.eup %2380  ;;  %2390 = vpow2.f32 %v751_v42  ;;  %v742_v49 = vsub.f32 0.0, %v734_v43  ;;  %v727_v54 = vsub.f32 %v3278_v40, %v3282_v44  ;;  %v665_v57 = vmul.f32 1.442695, %v654_v45 }
 0x12b   : > { %v675_v56 = vadd.f32 1.0, %v2381_v48  ;;  %v647_v60 = vand.u32 2147483647, %v639_v46  ;;  %v3291_v61 = vpop.permute.xlu0 %611  ;;  %v3293_v63 = vpop.permute.xlu1 %555  ;;  %v3317_v48 = vld [vmem:[%s3139_s14 + $0x38] sm:$0xff] }
 0x12c   : > { %v2383_v2 = vpop.eup %2382  ;;  %v753_v3 = vmul.f32 1.442695, %v742_v49  ;;  %v735_v4 = vand.u32 2147483647, %v727_v54  ;;  %v3297_v5 = vadd.f32 %v3291_v61, %v3287_v47  ;;  %v640_v13 = vsub.f32 %v3293_v63, %v3291_v61 }
 0x12d   : > { %2392 = vlog2.f32 %v675_v56  ;;  %v763_v9 = vadd.f32 1.0, %v2383_v2  ;;  %v655_v10 = vsub.f32 0.0, %v647_v60 }
 0x12e   : > { %2394 = vpow2.f32 %v665_v57  ;;  %v743_v14 = vsub.f32 0.0, %v735_v4  ;;  %v728_v17 = vsub.f32 %v3293_v63, %v3297_v5  ;;  %v648_v25 = vand.u32 2147483647, %v640_v13 }
 0x12f   : > { %v2385_v19 = vpop.eup %2384  ;;  %2396 = vlog2.f32 %v763_v9  ;;  %v667_v20 = vmul.f32 1.442695, %v655_v10  ;;  %v3306_v26 = vpop.permute.xlu0 %618 }
 0x130   : > { %v3308_v29 = vpop.permute.xlu1 %562  ;;  %v2387_v31 = vpop.eup %2386  ;;  %v676_v34 = vadd.f32 1.0, %v2385_v19  ;;  %2398 = vpow2.f32 %v753_v3  ;;  %v755_v35 = vmul.f32 1.442695, %v743_v14  ;;  %v736_v36 = vand.u32 2147483647, %v728_v17 }
 0x131   : > { %v764_v38 = vadd.f32 1.0, %v2387_v31  ;;  %2400 = vpow2.f32 %v667_v20  ;;  %v656_v42 = vsub.f32 0.0, %v648_v25  ;;  %v3312_v43 = vadd.f32 %v3306_v26, %v3304_v18 }
 0x132   : > { %2402 = vlog2.f32 %v676_v34  ;;  %v744_v45 = vsub.f32 0.0, %v736_v36  ;;  %v641_v46 = vsub.f32 %v3308_v29, %v3306_v26 }
 0x133   : > { %v2389_v49 = vpop.eup %2388  ;;  %2404 = vlog2.f32 %v764_v38  ;;  %v669_v54 = vmul.f32 1.442695, %v656_v42  ;;  %v729_v56 = vsub.f32 %v3308_v29, %v3312_v43  ;;  %v3321_v57 = vpop.permute.xlu0 %625 }
 0x134   : > { %v3323_v60 = vpop.permute.xlu1 %569  ;;  %v2391_v2 = vpop.eup %2390  ;;  %v677_v3 = vadd.f32 1.0, %v2389_v49  ;;  %2406 = vpow2.f32 %v755_v35  ;;  %v757_v4 = vmul.f32 1.442695, %v744_v45  ;;  %v649_v9 = vand.u32 2147483647, %v641_v46 }
 0x135   : > { %v765_v10 = vadd.f32 1.0, %v2391_v2  ;;  %2408 = vpow2.f32 %v669_v54  ;;  %v737_v13 = vand.u32 2147483647, %v729_v56  ;;  %v3327_v14 = vadd.f32 %v3321_v57, %v3317_v48 }
 0x136   : > { %2410 = vlog2.f32 %v677_v3  ;;  %v657_v17 = vsub.f32 0.0, %v649_v9  ;;  %v642_v19 = vsub.f32 %v3323_v60, %v3321_v57  ;;  %v627_v45 = vmax.f32 %v3218_v52, %v3216_v51 }
 0x137   : > { %v2393_v20 = vpop.eup %2392  ;;  %2412 = vlog2.f32 %v765_v10  ;;  %v745_v25 = vsub.f32 0.0, %v737_v13  ;;  %v730_v31 = vsub.f32 %v3323_v60, %v3327_v14  ;;  %v715_v2 = vmax.f32 %v3218_v52, %v3222_v53 }
 0x138   : > { %v2395_v34 = vpop.eup %2394  ;;  %v684_v35 = vmul.f32 0.6931472, %v2393_v20  ;;  %2414 = vpow2.f32 %v757_v4  ;;  %v671_v36 = vmul.f32 1.442695, %v657_v17  ;;  %v650_v38 = vand.u32 2147483647, %v642_v19 }
 0x139   : > { %v2397_v42 = vpop.eup %2396  ;;  %v678_v46 = vadd.f32 1.0, %v2395_v34  ;;  %v759_v49 = vmul.f32 1.442695, %v745_v25  ;;  %v738_v54 = vand.u32 2147483647, %v730_v31  ;;  %v628_v34 = vmax.f32 %v3233_v59, %v3231_v58 }
 0x13a   : > { %v2399_v56 = vpop.eup %2398  ;;  %v772_v3 = vmul.f32 0.6931472, %v2397_v42  ;;  %2416 = vpow2.f32 %v671_v36  ;;  %v658_v9 = vsub.f32 0.0, %v650_v38  ;;  %v3337_v13 = vadd.f32 %v684_v35, %v627_v45 }
 0x13b   : > { %v2401_v10 = vpop.eup %2400  ;;  %2418 = vlog2.f32 %v678_v46  ;;  %v766_v4 = vadd.f32 1.0, %v2399_v56  ;;  %v746_v17 = vsub.f32 0.0, %v738_v54  ;;  %v716_v38 = vmax.f32 %v3233_v59, %v3237_v62 }
 0x13c   : > { %v2403_v19 = vpop.eup %2402  ;;  %v3339_v20 = vadd.f32 %v772_v3, %v715_v2  ;;  %v679_v51 = vadd.f32 1.0, %v2401_v10  ;;  %2420 = vpow2.f32 %v759_v49  ;;  %v673_v25 = vmul.f32 1.442695, %v658_v9 }
 0x13d   : > { %v2405_v31 = vpop.eup %2404  ;;  %v686_v52 = vmul.f32 0.6931472, %v2403_v19  ;;  %2422 = vlog2.f32 %v766_v4  ;;  %v761_v53 = vmul.f32 1.442695, %v746_v17  ;;  %v629_v9 = vmax.f32 %v3248_v7, %v3246_v6 }
 0x13e   : > { %v2407_v36 = vpop.eup %2406  ;;  %v803_v35 = vsub.f32 %v3337_v13, %v3339_v20  ;;  %v774_v42 = vmul.f32 0.6931472, %v2405_v31  ;;  %2424 = vlog2.f32 %v679_v51  ;;  %v717_v17 = vmax.f32 %v3248_v7, %v3252_v11 }
 0x13f   : > { %v2409_v45 = vpop.eup %2408  ;;  %v3347_v46 = vadd.f32 %v686_v52, %v628_v34  ;;  %v767_v49 = vadd.f32 1.0, %v2407_v36  ;;  %2426 = vpow2.f32 %v673_v25  ;;  %v630_v7 = vmax.f32 %v3263_v23, %v3261_v22 }
 0x140   : > { %v2411_v54 = vpop.eup %2410  ;;  %v811_v56 = vand.u32 2147483647, %v803_v35  ;;  %v3349_v58 = vadd.f32 %v774_v42, %v716_v38  ;;  %v680_v2 = vadd.f32 1.0, %v2409_v45  ;;  %2428 = vpow2.f32 %v761_v53 }
 0x141   : > { %v2413_v3 = vpop.eup %2412  ;;  %v688_v10 = vmul.f32 0.6931472, %v2411_v54  ;;  %2430 = vlog2.f32 %v767_v49  ;;  %v718_v49 = vmax.f32 %v3263_v23, %v3267_v28  ;;  %v631_v23 = vmax.f32 %v3278_v40, %v3276_v39 }
 0x142   : > { %v2415_v59 = vpop.eup %2414  ;;  %v819_v62 = vsub.f32 0.0, %v811_v56  ;;  %v804_v4 = vsub.f32 %v3347_v46, %v3349_v58  ;;  %v776_v19 = vmul.f32 0.6931472, %v2413_v3  ;;  %2432 = vlog2.f32 %v680_v2 }
 0x143   : > { %v768_v51 = vadd.f32 1.0, %v2415_v59  ;;  %v3357_v52 = vadd.f32 %v688_v10, %v629_v9 }
 0x144   : > { %v2417_v25 = vpop.eup %2416  ;;  %v827_v31 = vmul.f32 1.442695, %v819_v62  ;;  %v812_v34 = vand.u32 2147483647, %v804_v4  ;;  %v3359_v53 = vadd.f32 %v776_v19, %v717_v17 }
 0x145   : > { %v2419_v6 = vpop.eup %2418  ;;  %2434 = vlog2.f32 %v768_v51  ;;  %v681_v36 = vadd.f32 1.0, %v2417_v25 }
 0x146   : > { %v2421_v35 = vpop.eup %2420  ;;  %v820_v38 = vsub.f32 0.0, %v812_v34  ;;  %v805_v42 = vsub.f32 %v3357_v52, %v3359_v53  ;;  %v690_v45 = vmul.f32 0.6931472, %v2419_v6  ;;  %v719_v34 = vmax.f32 %v3278_v40, %v3282_v44 }
 0x147   : > { %v2423_v11 = vpop.eup %2422  ;;  %2436 = vlog2.f32 %v681_v36  ;;  %v769_v54 = vadd.f32 1.0, %v2421_v35  ;;  %v632_v40 = vmax.f32 %v3293_v63, %v3291_v61  ;;  %v720_v44 = vmax.f32 %v3293_v63, %v3297_v5 }
 0x148   : > { %v2425_v56 = vpop.eup %2424  ;;  %2438 = vpow2.f32 %v827_v31  ;;  %v829_v2 = vmul.f32 1.442695, %v820_v38  ;;  %v813_v3 = vand.u32 2147483647, %v805_v42  ;;  %v778_v9 = vmul.f32 0.6931472, %v2423_v11 }
 0x149   : > { %v2427_v10 = vpop.eup %2426  ;;  %v3367_v59 = vadd.f32 %v690_v45, %v630_v7  ;;  %v692_v62 = vmul.f32 0.6931472, %v2425_v56  ;;  %2440 = vlog2.f32 %v769_v54  ;;  %v721_v61 = vmax.f32 %v3308_v29, %v3312_v43 }
 0x14a   : > { %v2429_v4 = vpop.eup %2428  ;;  %2442 = vpow2.f32 %v829_v2  ;;  %v821_v22 = vsub.f32 0.0, %v813_v3  ;;  %v3369_v17 = vadd.f32 %v778_v9, %v718_v49  ;;  %v682_v19 = vadd.f32 1.0, %v2427_v10 }
 0x14b   : > { %v2431_v51 = vpop.eup %2430  ;;  %v770_v28 = vadd.f32 1.0, %v2429_v4  ;;  %v3377_v38 = vadd.f32 %v692_v62, %v631_v23  ;;  %v2920_v23 = vmov 1966171168  }
 0x14c   : > { %v831_v25 = vmul.f32 1.442695, %v821_v22  ;;  %v806_v31 = vsub.f32 %v3367_v59, %v3369_v17  ;;  %v780_v6 = vmul.f32 0.6931472, %v2431_v51  ;;  %v2433_v36 = vpop.eup %2432  ;;  %2444 = vlog2.f32 %v682_v19 }
 0x14d   : > { %v694_v11 = vmul.f32 0.6931472, %v2433_v36  ;;  %v633_v22 = vmax.f32 %v3308_v29, %v3306_v26 }
 0x14e   : > { %2446 = vpow2.f32 %v831_v25  ;;  %v814_v35 = vand.u32 2147483647, %v806_v31  ;;  %v3379_v42 = vadd.f32 %v780_v6, %v719_v34 }
 0x14f   : > { %v2435_v7 = vpop.eup %2434  ;;  %2448 = vlog2.f32 %v770_v28  ;;  %v3387_v62 = vadd.f32 %v694_v11, %v632_v40  ;;  %v408_v28 = vunpack.c.l.s4 %v2920_v23 }
 0x150   : > { %v822_v39 = vsub.f32 0.0, %v814_v35  ;;  %v807_v45 = vsub.f32 %v3377_v38, %v3379_v42  ;;  %v782_v54 = vmul.f32 0.6931472, %v2435_v7 }
 0x151   : > { %v2437_v49 = vpop.eup %2436  ;;  %v409_v40 = vunpack.c.0.s8 %v408_v28 }
 0x152   : > { %v2439_v56 = vpop.eup %2438  ;;  %v833_v2 = vmul.f32 1.442695, %v822_v39  ;;  %v815_v3 = vand.u32 2147483647, %v807_v45  ;;  %v696_v9 = vmul.f32 0.6931472, %v2437_v49  ;;  %v3389_v4 = vadd.f32 %v782_v54, %v720_v44 }
 0x153   : > { %v2441_v10 = vpop.eup %2440  ;;  %v843_v25 = vadd.f32 1.0, %v2439_v56  ;;  %v634_v49 = vmax.f32 %v3323_v60, %v3321_v57  ;;  %v722_v54 = vmax.f32 %v3323_v60, %v3327_v14  ;;  %v406_v60 = vcombine.high %v3195_v41, %v3195_v41 }
 0x154   : > { %v2443_v19 = vpop.eup %2442  ;;  %2450 = vpow2.f32 %v833_v2  ;;  %v823_v51 = vsub.f32 0.0, %v815_v3  ;;  %v784_v63 = vmul.f32 0.6931472, %v2441_v10  ;;  %v808_v5 = vsub.f32 %v3387_v62, %v3389_v4 }
 0x155   : > { %v3397_v34 = vadd.f32 %v696_v9, %v633_v22  ;;  %v844_v26 = vadd.f32 1.0, %v2443_v19  ;;  %v412_v22 = vsub.s32 %v409_v40, %v3150_v8 }
 0x156   : > { %v835_v31 = vmul.f32 1.442695, %v823_v51  ;;  %v3399_v6 = vadd.f32 %v784_v63, %v721_v61  ;;  %v2445_v36 = vpop.eup %2444  ;;  %v816_v35 = vand.u32 2147483647, %v808_v5 }
 0x157   : > { %v698_v43 = vmul.f32 0.6931472, %v2445_v36  ;;  %v413_v63 = vrot.slane %v3195_v41, %v412_v22 }
 0x158   : > { %v2447_v7 = vpop.eup %2446  ;;  %2452 = vpow2.f32 %v835_v31  ;;  %v809_v29 = vsub.f32 %v3397_v34, %v3399_v6  ;;  %v824_v45 = vsub.f32 0.0, %v816_v35  ;;  %v420_v31 = vrot.slane %v406_v60, %v412_v22 }
 0x159   : > { %v2449_v11 = vpop.eup %2448  ;;  %v845_v39 = vadd.f32 1.0, %v2447_v7  ;;  %2454 = vlog2.f32 %v843_v25  ;;  %v3407_v9 = vadd.f32 %v698_v43, %v634_v49  ;;  %v421_v25 = vcombine.high %v413_v63, %v413_v63 }
 0x15a   : > { %v817_v44 = vand.u32 2147483647, %v809_v29  ;;  %v786_v56 = vmul.f32 0.6931472, %v2449_v11  ;;  %2456 = vlog2.f32 %v844_v26  ;;  %v837_v2 = vmul.f32 1.442695, %v824_v45  ;;  %v355_v11 = vpop.permute.xlu0 %354 }
 0x15b   : > { %2458 = vlog2.f32 %v845_v39  ;;  %v429_v35 = vrot.slane %v413_v63, %v412_v22  ;;  %v422_v7 = vcombine.high %v420_v31, %v420_v31  ;;  %v443_v39 = vrot.slane %v421_v25, %v412_v22 }
 0x15c   : > { %v825_v3 = vsub.f32 0.0, %v817_v44  ;;  %v3409_v10 = vadd.f32 %v786_v56, %v722_v54  ;;  %2460 = vpow2.f32 %v837_v2  ;;  %v436_v49 = vrot.slane %v420_v31, %v412_v22  ;;  %v362_v54 = vpop.permute.xlu1 %361 }
 0x15d   : > { %v451_v45 = vcombine.high %v429_v35, %v429_v35  ;;  %v453_v56 = vcombine.high %v443_v39, %v443_v39  ;;  %v450_v2 = vrot.slane %v422_v7, %v412_v22  ;;  %v462_v63 = vrot.slane %v443_v39, %v3154_v12 }
 0x15e   : > { %v2451_v19 = vpop.eup %2450  ;;  %v839_v57 = vmul.f32 1.442695, %v825_v3  ;;  %v810_v51 = vsub.f32 %v3407_v9, %v3409_v10  ;;  %v452_v3 = vcombine.high %v436_v49, %v436_v49  ;;  %v797_v31 = vmax.f32 %v3357_v52, %v3359_v53 }
 0x15f   : > { %v846_v61 = vadd.f32 1.0, %v2451_v19  ;;  %v478_v39 = vrot.slane %v450_v2, %v3154_v12 }
 0x160   : > { %2462 = vpow2.f32 %v839_v57  ;;  %v818_v14 = vand.u32 2147483647, %v810_v51  ;;  %v795_v57 = vmax.f32 %v3337_v13, %v3339_v20  ;;  %v796_v51 = vmax.f32 %v3347_v46, %v3349_v58  ;;  %v376_v7 = vpop.permute.xlu1 %375 }
 0x161   : > { %2464 = vlog2.f32 %v846_v61 }
 0x162   : > { %v2453_v5 = vpop.eup %2452  ;;  %v826_v23 = vsub.f32 0.0, %v818_v14  ;;  %v458_v14 = vrot.slane %v429_v35, %v3154_v12 }
 0x163   : > { %v847_v28 = vadd.f32 1.0, %v2453_v5  ;;  %v2455_v8 = vpop.eup %2454  ;;  %v466_v5 = vrot.slane %v451_v45, %v3154_v12  ;;  %v482_v45 = vrot.slane %v452_v3, %v3154_v12 }
 0x164   : > { %v841_v36 = vmul.f32 1.442695, %v826_v23  ;;  %v2457_v26 = vpop.eup %2456  ;;  %v852_v40 = vmul.f32 0.6931472, %v2455_v8  ;;  %v369_v23 = vpop.permute.xlu0 %368 }
 0x165   : > { %2466 = vlog2.f32 %v847_v28  ;;  %v2459_v29 = vpop.eup %2458  ;;  %v854_v41 = vmul.f32 0.6931472, %v2457_v26  ;;  %v470_v26 = vrot.slane %v453_v56, %v3154_v12 }
 0x166   : > { %2468 = vpow2.f32 %v841_v36  ;;  %v2461_v43 = vpop.eup %2460  ;;  %v856_v61 = vmul.f32 0.6931472, %v2459_v29  ;;  %v867_v22 = vadd.f32 %v852_v40, %v795_v57  ;;  %v798_v36 = vmax.f32 %v3367_v59, %v3369_v17 }
 0x167   : > { %v848_v44 = vadd.f32 1.0, %v2461_v43  ;;  %v868_v25 = vadd.f32 %v854_v41, %v796_v51  ;;  %v454_v29 = vcombine.high %v450_v2, %v450_v2  ;;  %v474_v43 = vrot.slane %v436_v49, %v3154_v12 }
 0x168   : > { %v869_v35 = vadd.f32 %v856_v61, %v797_v31  ;;  %v3436_v57 = vmul.f32 %v462_v63, %v362_v54  ;;  %v383_v56 = vpop.permute.xlu0 %382  ;;  %v3448_v61 = vsub.f32 %v3337_v13, %v867_v22  ;;  %v3459_v31 = vmul.f32 %v470_v26, %v376_v7 }
 0x169   : > { %2470 = vlog2.f32 %v848_v44  ;;  %v799_v44 = vmax.f32 %v3377_v38, %v3379_v42  ;;  %v3442_v49 = vsub.f32 %v3347_v46, %v868_v25  ;;  %v3445_v2 = vsub.f32 %v3349_v58, %v868_v25 }
 0x16a   : > { %v2463_v19 = vpop.eup %2462  ;;  %v486_v54 = vrot.slane %v454_v29, %v3154_v12  ;;  %v3454_v63 = vsub.f32 %v3357_v52, %v869_v35 }
 0x16b   : > { %v2465_v60 = vpop.eup %2464  ;;  %v849_v28 = vadd.f32 1.0, %v2463_v19  ;;  %v3434_v19 = vmul.f32 %v458_v14, %v355_v11  ;;  %v390_v11 = vpop.permute.xlu1 %389 }
 0x16c   : > { %v858_v8 = vmul.f32 0.6931472, %v2465_v60  ;;  %v3439_v60 = vsub.f32 %v3339_v20, %v867_v22  ;;  %v3457_v20 = vsub.f32 %v3359_v53, %v869_v35  ;;  %v3469_v25 = vmul.f32 %v478_v39, %v390_v11 }
 0x16d   : > { %2472 = vlog2.f32 %v849_v28  ;;  %v3450_v28 = vmul.f32 %v466_v5, %v369_v23  ;;  %v3467_v5 = vmul.f32 %v474_v43, %v383_v56  ;;  %v397_v23 = vpop.permute.xlu0 %396  ;;  %v916_v53 = vmul.f32 %v3445_v2, %v3436_v57 }
 0x16e   : > { %v870_v41 = vadd.f32 %v858_v8, %v798_v36  ;;  %4335 = vst [vmem:[#allocation18_spill] sm:$0xff] %v3469_v25  ;;  %v915_v52 = vmul.f32 %v3439_v60, %v3434_v19  ;;  %v891_v26 = vmul.f32 %v3448_v61, %v3434_v19  ;;  %v3487_v29 = vmul.f32 %v482_v45, %v397_v23 }
 0x16f   : > { %v2467_v40 = vpop.eup %2466  ;;  %4334 = vst [vmem:[#allocation17_spill] sm:$0xff] %v3467_v5  ;;  %v917_v35 = vmul.f32 %v3457_v20, %v3450_v28  ;;  %v893_v43 = vmul.f32 %v3454_v63, %v3450_v28  ;;  %v801_v39 = vmax.f32 %v3397_v34, %v3399_v6  ;;  %v924_v56 = vsel %vm899_vm1, %v916_v53, 0.0 }
 0x170   : > { %v2469_v51 = vpop.eup %2468  ;;  %v860_v3 = vmul.f32 0.6931472, %v2467_v40  ;;  %v3462_v58 = vsub.f32 %v3367_v59, %v870_v41  ;;  %v3465_v13 = vsub.f32 %v3369_v17, %v870_v41  ;;  %v892_v59 = vmul.f32 %v3442_v49, %v3436_v57 }
 0x171   : > { %v850_v14 = vadd.f32 1.0, %v2469_v51  ;;  %v800_v17 = vmax.f32 %v3387_v62, %v3389_v4  ;;  %v923_v45 = vsel %vm899_vm1, %v915_v52, 0.0  ;;  %v903_v53 = vsel %vm899_vm1, %v893_v43, 0.0  ;;  %v404_v43 = vpop.permute.xlu1 %403 }
 0x172   : > { %v871_v46 = vadd.f32 %v860_v3, %v799_v44  ;;  %v918_v41 = vmul.f32 %v3465_v13, %v3459_v31  ;;  %v901_v51 = vsel %vm899_vm1, %v892_v59, 0.0  ;;  %v925_v59 = vadd.f32 %v924_v56, %v923_v45 }
 0x173   : > { %2474 = vlog2.f32 %v850_v14  ;;  %v2471_v22 = vpop.eup %2470 }
 0x174   : > { %v3478_v8 = vsub.f32 %v3379_v42, %v871_v46  ;;  %v862_v36 = vmul.f32 0.6931472, %v2471_v22  ;;  %v3485_v7 = vsub.f32 %v3377_v38, %v871_v46  ;;  %v894_v38 = vmul.f32 %v3462_v58, %v3459_v31 }
 0x175   : > { %v900_v46 = vsel %vm899_vm1, %v891_v26, 0.0  ;;  %v926_v22 = vsel %vm899_vm1, %v917_v35, 0.0 }
 0x176   : > { %v872_v40 = vadd.f32 %v862_v36, %v800_v17  ;;  %v919_v11 = vmul.f32 %v3478_v8, %v3467_v5  ;;  %v895_v52 = vmul.f32 %v3485_v7, %v3467_v5  ;;  %v902_v17 = vadd.f32 %v901_v51, %v900_v46 }
 0x177   : > { %v2473_v42 = vpop.eup %2472  ;;  %v905_v36 = vsel %vm899_vm1, %v894_v38, 0.0 }
 0x178   : > { %v864_v44 = vmul.f32 0.6931472, %v2473_v42  ;;  %v3503_v3 = vsub.f32 %v3389_v4, %v872_v40  ;;  %v3508_v14 = vsub.f32 %v3387_v62, %v872_v40  ;;  %v928_v4 = vsel %vm899_vm1, %v918_v41, 0.0 }
 0x179   : > { %v802_v40 = vmax.f32 %v3407_v9, %v3409_v10  ;;  %v927_v41 = vadd.f32 %v926_v22, %v925_v59  ;;  %v930_v38 = vsel %vm899_vm1, %v919_v11, 0.0  ;;  %v907_v56 = vsel %vm899_vm1, %v895_v52, 0.0 }
 0x17a   : > { %v873_v23 = vadd.f32 %v864_v44, %v801_v39  ;;  %v920_v62 = vmul.f32 %v3503_v3, %v3469_v25  ;;  %v896_v35 = vmul.f32 %v3508_v14, %v3469_v25  ;;  %v904_v44 = vadd.f32 %v903_v53, %v902_v17 }
 0x17b   : > { %v929_v51 = vadd.f32 %v928_v4, %v927_v41 }
 0x17c   : > { %v3518_v42 = vsub.f32 %v3399_v6, %v873_v23  ;;  %v3523_v26 = vsub.f32 %v3397_v34, %v873_v23  ;;  %v906_v46 = vadd.f32 %v905_v36, %v904_v44  ;;  %v3535_v23 = vmul.f32 %v486_v54, %v404_v43 }
 0x17d   : > { %v2475_v39 = vpop.eup %2474  ;;  %v932_v5 = vsel %vm899_vm1, %v920_v62, 0.0  ;;  %v909_v22 = vsel %vm899_vm1, %v896_v35, 0.0  ;;  %v931_v11 = vadd.f32 %v930_v38, %v929_v51 }
 0x17e   : > { %v866_v6 = vmul.f32 0.6931472, %v2475_v39  ;;  %v921_v45 = vmul.f32 %v3518_v42, %v3487_v29  ;;  %v897_v34 = vmul.f32 %v3523_v26, %v3487_v29  ;;  %v908_v53 = vadd.f32 %v907_v56, %v906_v46 }
 0x17f   : > { %v933_v4 = vadd.f32 %v932_v5, %v931_v11 }
 0x180   : > { %v874_v25 = vadd.f32 %v866_v6, %v802_v40  ;;  %v934_v17 = vsel %vm899_vm1, %v921_v45, 0.0  ;;  %v911_v54 = vsel %vm899_vm1, %v897_v34, 0.0  ;;  %v910_v36 = vadd.f32 %v909_v22, %v908_v53 }
 0x181   : > { %v935_v39 = vadd.f32 %v934_v17, %v933_v4 }
 0x182   : > { %v3540_v59 = vsub.f32 %v3409_v10, %v874_v25  ;;  %v3544_v52 = vsub.f32 %v3407_v9, %v874_v25  ;;  %v912_v10 = vadd.f32 %v911_v54, %v910_v36  ;;  %v3556_v9 = vld [vmem:[%s285_s28] sm:$0xff] }
 0x184   : > { %v922_v62 = vmul.f32 %v3540_v59, %v3535_v23  ;;  %v898_v35 = vmul.f32 %v3544_v52, %v3535_v23 }
 0x186   : > { %v936_v43 = vsel %vm899_vm1, %v922_v62, 0.0  ;;  %v913_v40 = vsel %vm899_vm1, %v898_v35, 0.0 }
 0x187   : > { %v937_v41 = vadd.f32 %v936_v43, %v935_v39  ;;  %v914_v38 = vadd.f32 %v913_v40, %v912_v10 }
 0x189   : > { %971 = vxpose.xlu0.b32.start.end [1/1] (short) (narrow) %v937_v41, 8  ;;  %938 = vxpose.xlu1.b32.start.end [1/1] (short) (narrow) %v914_v38, 8 }
 0x209   : > { %v987_v5 = vpop.trf.xlu0  ;;  %v954_v25 = vpop.trf.xlu1 }
 0x20a   : > { %v1003_v44 = vmul.f32 %v987_v5, %v3556_v9  ;;  %v970_v6 = vmul.f32 %v954_v25, %v3556_v9 }
 0x20c   : > { %v1004_v45 = vadd.f32 %v1003_v44, %v3147_v0 }
 0x20e   : > { %v1006_v34 = vsub.f32 %v970_v6, %v1004_v45  ;;  %v1005_v17 = vmax.f32 %v970_v6, %v1004_v45 }
 0x210   : > { %v1007_v56 = vand.u32 2147483647, %v1006_v34 }
 0x212   : > { %v1008_v51 = vsub.f32 0.0, %v1007_v56 }
 0x214   : > { %v1009_v46 = vmul.f32 1.442695, %v1008_v51 }
 0x216   : > { %2476 = vpow2.f32 %v1009_v46 }
 0x220   : > { %v2477_v22 = vpop.eup %2476 }
 0x221   : > { %v1011_v11 = vadd.f32 1.0, %v2477_v22 }
 0x223   : > { %2478 = vlog2.f32 %v1011_v11 }
 0x22d   : > { %v2479_v53 = vpop.eup %2478 }
 0x22e   : > { %v1013_v54 = vmul.f32 0.6931472, %v2479_v53 }
 0x230   : > { %v1014_v4 = vadd.f32 %v1013_v54, %v1005_v17 }
 0x232   : > { %v1016_v36 = vsub.f32 %v1004_v45, %v1014_v4  ;;  %v1015_v62 = vsub.f32 %v970_v6, %v1014_v4 }
 0x234   : > { %v1091_v35 = vrot.slane %v1016_v36, %v3158_v16  ;;  %v1084_v39 = vrot.slane %v1016_v36, %v3154_v12  ;;  %v1027_v0 = vrot.slane %v1015_v62, %v3158_v16  ;;  %v1020_v10 = vrot.slane %v1015_v62, %v3154_v12 }
 0x235   : > { %v1034_v43 = vrot.slane %v1015_v62, %v3165_v21  ;;  %v1098_v40 = vrot.slane %v1016_v36, %v3165_v21  ;;  %v1041_v41 = vrot.slane %v1015_v62, %v3170_v24  ;;  %v1105_v38 = vrot.slane %v1016_v36, %v3170_v24 }
 0x236   : > { %1093 = vbcast.lane.b32.xlu1 %v1091_v35, 256  ;;  %1086 = vbcast.lane.b32.xlu0 %v1084_v39, 256  ;;  %v1048_v5 = vrot.slane %v1015_v62, %v3175_v27  ;;  %v1112_v25 = vrot.slane %v1016_v36, %v3175_v27  ;;  %v1055_v44 = vrot.slane %v1015_v62, %v3180_v30 }
 0x237   : > { %v1119_v6 = vrot.slane %v1016_v36, %v3180_v30  ;;  %v1062_v45 = vrot.slane %v1015_v62, %v3185_v33  ;;  %v1126_v34 = vrot.slane %v1016_v36, %v3185_v33  ;;  %v1069_v56 = vrot.slane %v1015_v62, %v3190_v37 }
 0x238   : > { %v1133_v51 = vrot.slane %v1016_v36, %v3190_v37 }
 0x23a   : > { %1029 = vbcast.lane.b32.xlu1 %v1027_v0, 256  ;;  %1022 = vbcast.lane.b32.xlu0 %v1020_v10, 256 }
 0x23e   : > { %1036 = vbcast.lane.b32.xlu1 %v1034_v43, 256  ;;  %1100 = vbcast.lane.b32.xlu0 %v1098_v40, 256 }
 0x242   : > { %1043 = vbcast.lane.b32.xlu1 %v1041_v41, 256  ;;  %1107 = vbcast.lane.b32.xlu0 %v1105_v38, 256 }
 0x246   : > { %1050 = vbcast.lane.b32.xlu1 %v1048_v5, 256  ;;  %1114 = vbcast.lane.b32.xlu0 %v1112_v25, 256 }
 0x24a   : > { %1057 = vbcast.lane.b32.xlu1 %v1055_v44, 256  ;;  %1121 = vbcast.lane.b32.xlu0 %v1119_v6, 256 }
 0x24e   : > { %1064 = vbcast.lane.b32.xlu1 %v1062_v45, 256  ;;  %1128 = vbcast.lane.b32.xlu0 %v1126_v34, 256 }
 0x252   : > { %1071 = vbcast.lane.b32.xlu1 %v1069_v56, 256  ;;  %1135 = vbcast.lane.b32.xlu0 %v1133_v51, 256 }
 0x2a8   : > { %v1094_v46 = vpop.permute.xlu1 %1093  ;;  %v1087_v22 = vpop.permute.xlu0 %1086 }
 0x2a9   : > { %v3578_v11 = vsub.f32 %v1094_v46, %v3445_v2  ;;  %v3581_v53 = vsub.f32 %v1087_v22, %v3439_v60 }
 0x2ab   : > { %v3585_v4 = vadd.f32 %v3578_v11, %v3227_v55  ;;  %v3595_v35 = vadd.f32 %v3581_v53, %v3214_v50 }
 0x2ac   : > { %v1030_v17 = vpop.permute.xlu1 %1029  ;;  %v1023_v54 = vpop.permute.xlu0 %1022 }
 0x2ad   : > { %v3588_v62 = vsub.f32 %v1030_v17, %v3442_v49  ;;  %v3591_v36 = vsub.f32 %v1023_v54, %v3448_v61 }
 0x2af   : > { %v1154_v60 = vsub.f32 %v3588_v62, %v3578_v11  ;;  %v1242_v2 = vsub.f32 %v3588_v62, %v3585_v4  ;;  %v1153_v55 = vsub.f32 %v3591_v36, %v3581_v53  ;;  %v1241_v49 = vsub.f32 %v3591_v36, %v3595_v35 }
 0x2b0   : > { %v1037_v39 = vpop.permute.xlu1 %1036  ;;  %v1101_v0 = vpop.permute.xlu0 %1100 }
 0x2b1   : > { %v1162_v61 = vand.u32 2147483647, %v1154_v60  ;;  %v1250_v10 = vand.u32 2147483647, %v1242_v2  ;;  %v3606_v43 = vsub.f32 %v1037_v39, %v3454_v63  ;;  %v3609_v50 = vsub.f32 %v1101_v0, %v3457_v20 }
 0x2b2   : > { %v1161_v40 = vand.u32 2147483647, %v1153_v55  ;;  %v1249_v41 = vand.u32 2147483647, %v1241_v49 }
 0x2b3   : > { %v1170_v38 = vsub.f32 0.0, %v1162_v61  ;;  %v1258_v5 = vsub.f32 0.0, %v1250_v10  ;;  %v1155_v25 = vsub.f32 %v3606_v43, %v3609_v50  ;;  %v3615_v45 = vadd.f32 %v3609_v50, %v3242_v1 }
 0x2b4   : > { %v1169_v44 = vsub.f32 0.0, %v1161_v40  ;;  %v1257_v6 = vsub.f32 0.0, %v1249_v41  ;;  %v1044_v34 = vpop.permute.xlu1 %1043  ;;  %v1108_v56 = vpop.permute.xlu0 %1107 }
 0x2b5   : > { %v1179_v63 = vmul.f32 1.442695, %v1170_v38  ;;  %v1267_v51 = vmul.f32 1.442695, %v1258_v5  ;;  %v1163_v46 = vand.u32 2147483647, %v1155_v25  ;;  %v3618_v20 = vsub.f32 %v1044_v34, %v3462_v58 }
 0x2b6   : > { %v1177_v22 = vmul.f32 1.442695, %v1169_v44  ;;  %v1265_v17 = vmul.f32 1.442695, %v1257_v6  ;;  %v1243_v54 = vsub.f32 %v3606_v43, %v3615_v45  ;;  %v3623_v2 = vsub.f32 %v1108_v56, %v3465_v13 }
 0x2b7   : > { %2480 = vpow2.f32 %v1179_v63  ;;  %v1171_v60 = vsub.f32 0.0, %v1163_v46 }
 0x2b8   : > { %2482 = vpow2.f32 %v1267_v51  ;;  %v1251_v1 = vand.u32 2147483647, %v1243_v54  ;;  %v1051_v55 = vpop.permute.xlu1 %1050  ;;  %v1115_v49 = vpop.permute.xlu0 %1114  ;;  %v1156_v58 = vsub.f32 %v3618_v20, %v3623_v2  ;;  %v3629_v61 = vadd.f32 %v3623_v2, %v3257_v15 }
 0x2b9   : > { %2484 = vpow2.f32 %v1177_v22  ;;  %v1181_v39 = vmul.f32 1.442695, %v1171_v60  ;;  %v3632_v10 = vsub.f32 %v1051_v55, %v3485_v7  ;;  %v3635_v40 = vsub.f32 %v1115_v49, %v3478_v8 }
 0x2ba   : > { %2486 = vpow2.f32 %v1265_v17  ;;  %v1259_v0 = vsub.f32 0.0, %v1251_v1  ;;  %v1164_v13 = vand.u32 2147483647, %v1156_v58  ;;  %v1244_v38 = vsub.f32 %v3618_v20, %v3629_v61 }
 0x2bb   : > { %2488 = vpow2.f32 %v1181_v39  ;;  %v1157_v6 = vsub.f32 %v3632_v10, %v3635_v40  ;;  %v3643_v15 = vadd.f32 %v3635_v40, %v3272_v32 }
 0x2bc   : > { %v1269_v41 = vmul.f32 1.442695, %v1259_v0  ;;  %v1058_v5 = vpop.permute.xlu1 %1057  ;;  %v1122_v25 = vpop.permute.xlu0 %1121  ;;  %v1172_v44 = vsub.f32 0.0, %v1164_v13  ;;  %v1252_v7 = vand.u32 2147483647, %v1244_v38 }
 0x2bd   : > { %v3646_v34 = vsub.f32 %v1058_v5, %v3508_v14  ;;  %v3649_v8 = vsub.f32 %v1122_v25, %v3503_v3  ;;  %v1165_v63 = vand.u32 2147483647, %v1157_v6  ;;  %v1245_v51 = vsub.f32 %v3632_v10, %v3643_v15 }
 0x2be   : > { %2490 = vpow2.f32 %v1269_v41  ;;  %v1183_v56 = vmul.f32 1.442695, %v1172_v44  ;;  %v1260_v46 = vsub.f32 0.0, %v1252_v7 }
 0x2bf   : > { %v1158_v22 = vsub.f32 %v3646_v34, %v3649_v8  ;;  %v3657_v32 = vadd.f32 %v3649_v8, %v3287_v47  ;;  %v1253_v60 = vand.u32 2147483647, %v1245_v51  ;;  %v1173_v55 = vsub.f32 0.0, %v1165_v63 }
 0x2c0   : > { %v1065_v17 = vpop.permute.xlu1 %1064  ;;  %v1129_v54 = vpop.permute.xlu0 %1128  ;;  %2492 = vpow2.f32 %v1183_v56  ;;  %v1271_v0 = vmul.f32 1.442695, %v1260_v46 }
 0x2c1   : > { %v2481_v14 = vpop.eup %2480  ;;  %v1166_v49 = vand.u32 2147483647, %v1158_v22  ;;  %v1246_v13 = vsub.f32 %v3646_v34, %v3657_v32  ;;  %v3662_v41 = vsub.f32 %v1065_v17, %v3523_v26  ;;  %v1261_v5 = vsub.f32 0.0, %v1253_v60 }
 0x2c2   : > { %v2483_v1 = vpop.eup %2482  ;;  %v1194_v3 = vadd.f32 1.0, %v2481_v14  ;;  %v3665_v25 = vsub.f32 %v1129_v54, %v3518_v42  ;;  %v1185_v22 = vmul.f32 1.442695, %v1173_v55 }
 0x2c3   : > { %v2485_v39 = vpop.eup %2484  ;;  %v1282_v58 = vadd.f32 1.0, %v2483_v1  ;;  %v1174_v7 = vsub.f32 0.0, %v1166_v49  ;;  %v1254_v56 = vand.u32 2147483647, %v1246_v13  ;;  %v1273_v54 = vmul.f32 1.442695, %v1261_v5 }
 0x2c4   : > { %v2487_v47 = vpop.eup %2486  ;;  %2494 = vlog2.f32 %v1194_v3  ;;  %v1193_v38 = vadd.f32 1.0, %v2485_v39  ;;  %v1072_v63 = vpop.permute.xlu1 %1071  ;;  %v1159_v17 = vsub.f32 %v3662_v41, %v3665_v25  ;;  %v3671_v14 = vadd.f32 %v3665_v25, %v3304_v18 }
 0x2c5   : > { %v2489_v44 = vpop.eup %2488  ;;  %2496 = vlog2.f32 %v1282_v58  ;;  %v1281_v6 = vadd.f32 1.0, %v2487_v47  ;;  %v1136_v51 = vpop.permute.xlu0 %1135  ;;  %v1262_v26 = vsub.f32 0.0, %v1254_v56  ;;  %v3674_v60 = vsub.f32 %v1072_v63, %v3544_v52 }
 0x2c6   : > { %2498 = vlog2.f32 %v1193_v38  ;;  %v1195_v46 = vadd.f32 1.0, %v2489_v44  ;;  %v3677_v1 = vsub.f32 %v1136_v51, %v3540_v59  ;;  %v1187_v55 = vmul.f32 1.442695, %v1174_v7 }
 0x2c7   : > { %2500 = vlog2.f32 %v1281_v6  ;;  %v1167_v49 = vand.u32 2147483647, %v1159_v17  ;;  %v1247_v39 = vsub.f32 %v3662_v41, %v3671_v14  ;;  %v1275_v18 = vmul.f32 1.442695, %v1262_v26 }
 0x2c8   : > { %v2491_v42 = vpop.eup %2490  ;;  %2502 = vlog2.f32 %v1195_v46  ;;  %v1160_v13 = vsub.f32 %v3674_v60, %v3677_v1 }
 0x2c9   : > { %v1283_v3 = vadd.f32 1.0, %v2491_v42  ;;  %2504 = vpow2.f32 %v1271_v0  ;;  %v1175_v58 = vsub.f32 0.0, %v1167_v49  ;;  %v1255_v52 = vand.u32 2147483647, %v1247_v39 }
 0x2ca   : > { %2506 = vpow2.f32 %v1185_v22  ;;  %v2493_v47 = vpop.eup %2492  ;;  %v3685_v0 = vadd.f32 %v3677_v1, %v3317_v48  ;;  %v1168_v44 = vand.u32 2147483647, %v1160_v13  ;;  %v1234_v39 = vmax.f32 %v3588_v62, %v3585_v4 }
 0x2cb   : > { %2508 = vlog2.f32 %v1283_v3  ;;  %v1189_v59 = vmul.f32 1.442695, %v1175_v58  ;;  %v1263_v5 = vsub.f32 0.0, %v1255_v52  ;;  %v1196_v7 = vadd.f32 1.0, %v2493_v47 }
 0x2cc   : > { %2510 = vpow2.f32 %v1273_v54  ;;  %v1248_v22 = vsub.f32 %v3674_v60, %v3685_v0  ;;  %v1176_v42 = vsub.f32 0.0, %v1168_v44  ;;  %v1146_v54 = vmax.f32 %v3588_v62, %v3578_v11 }
 0x2cd   : > { %2512 = vpow2.f32 %v1187_v55  ;;  %v1277_v63 = vmul.f32 1.442695, %v1263_v5  ;;  %v1233_v58 = vmax.f32 %v3591_v36, %v3595_v35  ;;  %v1235_v11 = vmax.f32 %v3606_v43, %v3615_v45 }
 0x2ce   : > { %v2495_v38 = vpop.eup %2494  ;;  %2514 = vpow2.f32 %v1275_v18  ;;  %v1145_v18 = vmax.f32 %v3591_v36, %v3581_v53  ;;  %v1191_v62 = vmul.f32 1.442695, %v1176_v42  ;;  %v1147_v35 = vmax.f32 %v3606_v43, %v3609_v50 }
 0x2cf   : > { %v2497_v6 = vpop.eup %2496  ;;  %2516 = vpow2.f32 %v1189_v59  ;;  %v1204_v46 = vmul.f32 0.6931472, %v2495_v38  ;;  %v1256_v38 = vand.u32 2147483647, %v1248_v22 }
 0x2d0   : > { %v2499_v56 = vpop.eup %2498  ;;  %v1292_v17 = vmul.f32 0.6931472, %v2497_v6  ;;  %2518 = vpow2.f32 %v1277_v63 }
 0x2d1   : > { %v2501_v51 = vpop.eup %2500  ;;  %v1202_v3 = vmul.f32 0.6931472, %v2499_v56  ;;  %2520 = vlog2.f32 %v1196_v7  ;;  %v3697_v52 = vadd.f32 %v1204_v46, %v1146_v54 }
 0x2d2   : > { %v2503_v26 = vpop.eup %2502  ;;  %v1290_v55 = vmul.f32 0.6931472, %v2501_v51  ;;  %v3701_v44 = vadd.f32 %v1292_v17, %v1234_v39  ;;  %v1264_v17 = vsub.f32 0.0, %v1256_v38  ;;  %v1148_v38 = vmax.f32 %v3618_v20, %v3623_v2 }
 0x2d3   : > { %v2505_v48 = vpop.eup %2504  ;;  %v1206_v6 = vmul.f32 0.6931472, %v2503_v26  ;;  %v3703_v53 = vadd.f32 %v1202_v3, %v1145_v18 }
 0x2d4   : > { %v2507_v49 = vpop.eup %2506  ;;  %v1284_v13 = vadd.f32 1.0, %v2505_v48  ;;  %v3705_v56 = vadd.f32 %v1290_v55, %v1233_v58  ;;  %v1322_v22 = vsub.f32 %v3697_v52, %v3701_v44  ;;  %v1279_v18 = vmul.f32 1.442695, %v1264_v17 }
 0x2d5   : > { %v2509_v47 = vpop.eup %2508  ;;  %v1197_v59 = vadd.f32 1.0, %v2507_v49  ;;  %v3713_v26 = vadd.f32 %v1206_v6, %v1147_v35 }
 0x2d6   : > { %v2511_v5 = vpop.eup %2510  ;;  %v1294_v4 = vmul.f32 0.6931472, %v2509_v47  ;;  %2522 = vlog2.f32 %v1284_v13  ;;  %v1321_v42 = vsub.f32 %v3703_v53, %v3705_v56  ;;  %v1330_v49 = vand.u32 2147483647, %v1322_v22 }
 0x2d7   : > { %v2513_v7 = vpop.eup %2512  ;;  %v1285_v36 = vadd.f32 1.0, %v2511_v5  ;;  %2524 = vlog2.f32 %v1197_v59  ;;  %v1236_v5 = vmax.f32 %v3618_v20, %v3629_v61 }
 0x2d8   : > { %v2515_v45 = vpop.eup %2514  ;;  %v3709_v63 = vadd.f32 %v1294_v4, %v1235_v11  ;;  %v1198_v51 = vadd.f32 1.0, %v2513_v7  ;;  %v1329_v39 = vand.u32 2147483647, %v1321_v42  ;;  %v1338_v59 = vsub.f32 0.0, %v1330_v49 }
 0x2d9   : > { %2526 = vlog2.f32 %v1285_v36  ;;  %v2517_v46 = vpop.eup %2516  ;;  %v1286_v48 = vadd.f32 1.0, %v2515_v45  ;;  %v1149_v7 = vmax.f32 %v3632_v10, %v3635_v40 }
 0x2da   : > { %2528 = vpow2.f32 %v1191_v62  ;;  %v1199_v43 = vadd.f32 1.0, %v2517_v46  ;;  %v2519_v50 = vpop.eup %2518  ;;  %v1323_v3 = vsub.f32 %v3713_v26, %v3709_v63  ;;  %v1337_v62 = vsub.f32 0.0, %v1329_v39 }
 0x2db   : > { %2530 = vlog2.f32 %v1198_v51  ;;  %v2521_v54 = vpop.eup %2520  ;;  %v1287_v55 = vadd.f32 1.0, %v2519_v50  ;;  %v1237_v46 = vmax.f32 %v3632_v10, %v3643_v15  ;;  %v1347_v20 = vmul.f32 1.442695, %v1338_v59 }
 0x2dc   : > { %2532 = vlog2.f32 %v1286_v48  ;;  %v1208_v58 = vmul.f32 0.6931472, %v2521_v54  ;;  %v1331_v47 = vand.u32 2147483647, %v1323_v3  ;;  %v1150_v50 = vmax.f32 %v3646_v34, %v3649_v8 }
 0x2dd   : > { %2534 = vlog2.f32 %v1199_v43  ;;  %v1345_v43 = vmul.f32 1.442695, %v1337_v62  ;;  %v1238_v15 = vmax.f32 %v3646_v34, %v3657_v32 }
 0x2de   : > { %2536 = vlog2.f32 %v1287_v55  ;;  %v3725_v45 = vadd.f32 %v1208_v58, %v1148_v38  ;;  %v1339_v17 = vsub.f32 0.0, %v1331_v47  ;;  %v1151_v58 = vmax.f32 %v3662_v41, %v3665_v25 }
 0x2df   : > { %2538 = vpow2.f32 %v1279_v18 }
 0x2e0   : > { %v2523_v13 = vpop.eup %2522  ;;  %v1349_v39 = vmul.f32 1.442695, %v1339_v17  ;;  %2540 = vpow2.f32 %v1347_v20 }
 0x2e1   : > { %v2525_v11 = vpop.eup %2524  ;;  %v1296_v6 = vmul.f32 0.6931472, %v2523_v13  ;;  %v1239_v13 = vmax.f32 %v3662_v41, %v3671_v14  ;;  %2542 = vpow2.f32 %v1345_v43 }
 0x2e2   : > { %v1210_v36 = vmul.f32 0.6931472, %v2525_v11 }
 0x2e3   : > { %v2527_v4 = vpop.eup %2526  ;;  %v3727_v51 = vadd.f32 %v1296_v6, %v1236_v5 }
 0x2e4   : > { %v2529_v35 = vpop.eup %2528  ;;  %v1298_v2 = vmul.f32 0.6931472, %v2527_v4  ;;  %v3733_v42 = vadd.f32 %v1210_v36, %v1149_v7 }
 0x2e5   : > { %v2531_v22 = vpop.eup %2530  ;;  %v1324_v61 = vsub.f32 %v3725_v45, %v3727_v51  ;;  %v1200_v55 = vadd.f32 1.0, %v2529_v35 }
 0x2e6   : > { %v3735_v40 = vadd.f32 %v1298_v2, %v1237_v46  ;;  %v2533_v48 = vpop.eup %2532  ;;  %v1212_v54 = vmul.f32 0.6931472, %v2531_v22 }
 0x2e7   : > { %v1332_v3 = vand.u32 2147483647, %v1324_v61  ;;  %v2535_v49 = vpop.eup %2534  ;;  %v1300_v18 = vmul.f32 0.6931472, %v2533_v48  ;;  %2544 = vlog2.f32 %v1200_v55 }
 0x2e8   : > { %v1325_v10 = vsub.f32 %v3733_v42, %v3735_v40  ;;  %v2537_v47 = vpop.eup %2536  ;;  %v1214_v59 = vmul.f32 0.6931472, %v2535_v49  ;;  %v3747_v38 = vadd.f32 %v1212_v54, %v1150_v50  ;;  %2546 = vpow2.f32 %v1349_v39 }
 0x2e9   : > { %v1340_v8 = vsub.f32 0.0, %v1332_v3  ;;  %v3749_v5 = vadd.f32 %v1300_v18, %v1238_v15  ;;  %v1302_v34 = vmul.f32 0.6931472, %v2537_v47  ;;  %v2539_v4 = vpop.eup %2538  ;;  %v1152_v18 = vmax.f32 %v3674_v60, %v3677_v1 }
 0x2ea   : > { %v1333_v11 = vand.u32 2147483647, %v1325_v10  ;;  %v3753_v41 = vadd.f32 %v1214_v59, %v1151_v58  ;;  %v1288_v7 = vadd.f32 1.0, %v2539_v4  ;;  %v2541_v20 = vpop.eup %2540  ;;  %v1240_v58 = vmax.f32 %v3674_v60, %v3685_v0 }
 0x2eb   : > { %v1351_v32 = vmul.f32 1.442695, %v1340_v8  ;;  %v1326_v25 = vsub.f32 %v3747_v38, %v3749_v5  ;;  %v3755_v14 = vadd.f32 %v1302_v34, %v1239_v13  ;;  %v2543_v61 = vpop.eup %2542  ;;  %v1362_v54 = vadd.f32 1.0, %v2541_v20 }
 0x2ec   : > { %v1341_v6 = vsub.f32 0.0, %v1333_v11  ;;  %v1361_v3 = vadd.f32 1.0, %v2543_v61 }
 0x2ed   : > { %2548 = vpow2.f32 %v1351_v32  ;;  %v1334_v36 = vand.u32 2147483647, %v1326_v25  ;;  %v1327_v35 = vsub.f32 %v3753_v41, %v3755_v14 }
 0x2ee   : > { %v1353_v62 = vmul.f32 1.442695, %v1341_v6 }
 0x2ef   : > { %v1342_v46 = vsub.f32 0.0, %v1334_v36  ;;  %v1335_v2 = vand.u32 2147483647, %v1327_v35 }
 0x2f0   : > { %2550 = vpow2.f32 %v1353_v62 }
 0x2f1   : > { %2552 = vlog2.f32 %v1288_v7  ;;  %v1355_v22 = vmul.f32 1.442695, %v1342_v46  ;;  %v1343_v17 = vsub.f32 0.0, %v1335_v2  ;;  %v2545_v43 = vpop.eup %2544  ;;  %v1314_v2 = vmax.f32 %v3697_v52, %v3701_v44 }
 0x2f2   : > { %v2547_v50 = vpop.eup %2546  ;;  %v1216_v49 = vmul.f32 0.6931472, %v2545_v43 }
 0x2f3   : > { %2554 = vpow2.f32 %v1355_v22  ;;  %v1357_v48 = vmul.f32 1.442695, %v1343_v17  ;;  %v1363_v55 = vadd.f32 1.0, %v2547_v50  ;;  %v1313_v17 = vmax.f32 %v3703_v53, %v3705_v56 }
 0x2f4   : > { %v3763_v11 = vadd.f32 %v1216_v49, %v1152_v18  ;;  %v1315_v50 = vmax.f32 %v3713_v26, %v3709_v63  ;;  %v1316_v49 = vmax.f32 %v3725_v45, %v3727_v51 }
 0x2f5   : > { %2556 = vpow2.f32 %v1357_v48 }
 0x2f6   : > { %2558 = vlog2.f32 %v1362_v54 }
 0x2f7   : > { %v2549_v10 = vpop.eup %2548  ;;  %2560 = vlog2.f32 %v1361_v3 }
 0x2f8   : > { %v1364_v47 = vadd.f32 1.0, %v2549_v10  ;;  %2562 = vlog2.f32 %v1363_v55 }
 0x2fa   : > { %v2551_v15 = vpop.eup %2550  ;;  %2564 = vlog2.f32 %v1364_v47  ;;  %v1317_v47 = vmax.f32 %v3733_v42, %v3735_v40 }
 0x2fb   : > { %v2553_v39 = vpop.eup %2552  ;;  %v1365_v8 = vadd.f32 1.0, %v2551_v15 }
 0x2fc   : > { %v1304_v13 = vmul.f32 0.6931472, %v2553_v39 }
 0x2fd   : > { %v2555_v34 = vpop.eup %2554  ;;  %2566 = vlog2.f32 %v1365_v8 }
 0x2fe   : > { %v3765_v59 = vadd.f32 %v1304_v13, %v1240_v58  ;;  %v1366_v4 = vadd.f32 1.0, %v2555_v34 }
 0x2ff   : > { %v2557_v6 = vpop.eup %2556 }
 0x300   : > { %v1328_v32 = vsub.f32 %v3763_v11, %v3765_v59  ;;  %v1367_v25 = vadd.f32 1.0, %v2557_v6  ;;  %v2559_v60 = vpop.eup %2558  ;;  %2568 = vlog2.f32 %v1366_v4 }
 0x301   : > { %v2561_v0 = vpop.eup %2560  ;;  %v1372_v35 = vmul.f32 0.6931472, %v2559_v60 }
 0x302   : > { %v1336_v1 = vand.u32 2147483647, %v1328_v32  ;;  %2570 = vlog2.f32 %v1367_v25  ;;  %v2563_v36 = vpop.eup %2562  ;;  %v1370_v46 = vmul.f32 0.6931472, %v2561_v0 }
 0x303   : > { %v1374_v20 = vmul.f32 0.6931472, %v2563_v36  ;;  %v1386_v48 = vadd.f32 %v1372_v35, %v1314_v2 }
 0x304   : > { %v1344_v62 = vsub.f32 0.0, %v1336_v1  ;;  %v2565_v22 = vpop.eup %2564  ;;  %v1385_v43 = vadd.f32 %v1370_v46, %v1313_v17 }
 0x305   : > { %v1376_v54 = vmul.f32 0.6931472, %v2565_v22  ;;  %v1387_v10 = vadd.f32 %v1374_v20, %v1315_v50  ;;  %v3776_v55 = vsub.f32 %v3697_v52, %v1386_v48  ;;  %v3781_v18 = vsub.f32 %v3701_v44, %v1386_v48 }
 0x306   : > { %v1359_v7 = vmul.f32 1.442695, %v1344_v62  ;;  %v3784_v58 = vsub.f32 %v3703_v53, %v1385_v43  ;;  %v3787_v13 = vsub.f32 %v3705_v56, %v1385_v43  ;;  %v1318_v56 = vmax.f32 %v3747_v38, %v3749_v5  ;;  %v4336_v43 = vld [vmem:[#allocation17_spill] sm:$0xff] }
 0x307   : > { %v2567_v61 = vpop.eup %2566  ;;  %v1388_v34 = vadd.f32 %v1376_v54, %v1316_v49  ;;  %v3792_v32 = vsub.f32 %v3709_v63, %v1387_v10  ;;  %v1410_v44 = vmul.f32 %v3776_v55, %v3436_v57  ;;  %v3797_v53 = vsub.f32 %v3713_v26, %v1387_v10 }
 0x308   : > { %2572 = vpow2.f32 %v1359_v7  ;;  %v1378_v15 = vmul.f32 0.6931472, %v2567_v61  ;;  %v1433_v25 = vmul.f32 %v3781_v18, %v3436_v57  ;;  %v1409_v62 = vmul.f32 %v3784_v58, %v3434_v19 }
 0x309   : > { %v1432_v63 = vmul.f32 %v3787_v13, %v3434_v19  ;;  %v3808_v60 = vsub.f32 %v3725_v45, %v1388_v34  ;;  %v3811_v26 = vsub.f32 %v3727_v51, %v1388_v34  ;;  %v1319_v7 = vmax.f32 %v3753_v41, %v3755_v14 }
 0x30a   : > { %v2569_v3 = vpop.eup %2568  ;;  %v1389_v6 = vadd.f32 %v1378_v15, %v1317_v47  ;;  %v1434_v36 = vmul.f32 %v3792_v32, %v3450_v28  ;;  %v1411_v46 = vmul.f32 %v3797_v53, %v3450_v28  ;;  %v1441_v22 = vsel %vm899_vm1, %v1433_v25, 0.0 }
 0x30b   : > { %v1380_v52 = vmul.f32 0.6931472, %v2569_v3  ;;  %v1440_v51 = vsel %vm899_vm1, %v1432_v63, 0.0  ;;  %v1417_v17 = vsel %vm899_vm1, %v1409_v62, 0.0  ;;  %v1418_v20 = vsel %vm899_vm1, %v1410_v44, 0.0 }
 0x30c   : > { %v2571_v39 = vpop.eup %2570  ;;  %v3818_v35 = vsub.f32 %v3735_v40, %v1389_v6  ;;  %v3823_v2 = vsub.f32 %v3733_v42, %v1389_v6  ;;  %v1412_v61 = vmul.f32 %v3808_v60, %v3459_v31  ;;  %v1435_v42 = vmul.f32 %v3811_v26, %v3459_v31 }
 0x30d   : > { %v1382_v1 = vmul.f32 0.6931472, %v2571_v39  ;;  %v1390_v0 = vadd.f32 %v1380_v52, %v1318_v56  ;;  %v1443_v54 = vsel %vm899_vm1, %v1434_v36, 0.0  ;;  %v1442_v15 = vadd.f32 %v1441_v22, %v1440_v51  ;;  %v4337_v39 = vld [vmem:[#allocation18_spill] sm:$0xff] }
 0x30e   : > { %v1436_v50 = vmul.f32 %v3818_v35, %v4336_v43  ;;  %v1419_v49 = vadd.f32 %v1418_v20, %v1417_v17 }
 0x30f   : > { %v1391_v45 = vadd.f32 %v1382_v1, %v1319_v7  ;;  %v3832_v40 = vsub.f32 %v3747_v38, %v1390_v0  ;;  %v3835_v48 = vsub.f32 %v3749_v5, %v1390_v0  ;;  %v1413_v38 = vmul.f32 %v3823_v2, %v4336_v43 }
 0x310   : > { %v1420_v5 = vsel %vm899_vm1, %v1411_v46, 0.0  ;;  %v1444_v6 = vadd.f32 %v1443_v54, %v1442_v15 }
 0x311   : > { %v3843_v3 = vsub.f32 %v3755_v14, %v1391_v45  ;;  %v3846_v10 = vsub.f32 %v3753_v41, %v1391_v45  ;;  %v1437_v47 = vmul.f32 %v3835_v48, %v4337_v39  ;;  %v1414_v34 = vmul.f32 %v3832_v40, %v4337_v39 }
 0x312   : > { %v2573_v8 = vpop.eup %2572  ;;  %v1422_v14 = vsel %vm899_vm1, %v1412_v61, 0.0  ;;  %v1320_v41 = vmax.f32 %v3763_v11, %v3765_v59  ;;  %v1421_v44 = vadd.f32 %v1420_v5, %v1419_v49  ;;  %v1424_v62 = vsel %vm899_vm1, %v1413_v38, 0.0 }
 0x313   : > { %v1368_v4 = vadd.f32 1.0, %v2573_v8  ;;  %v1445_v8 = vsel %vm899_vm1, %v1435_v42, 0.0  ;;  %v1438_v1 = vmul.f32 %v3843_v3, %v3487_v29  ;;  %v1415_v25 = vmul.f32 %v3846_v10, %v3487_v29 }
 0x314   : > { %v1446_v63 = vadd.f32 %v1445_v8, %v1444_v6  ;;  %v1423_v0 = vadd.f32 %v1422_v14, %v1421_v44  ;;  %v1449_v36 = vsel %vm899_vm1, %v1437_v47, 0.0  ;;  %v1426_v46 = vsel %vm899_vm1, %v1414_v34, 0.0 }
 0x315   : > { %2574 = vlog2.f32 %v1368_v4  ;;  %v1447_v4 = vsel %vm899_vm1, %v1436_v50, 0.0  ;;  %v1451_v17 = vsel %vm899_vm1, %v1438_v1, 0.0  ;;  %v1428_v61 = vsel %vm899_vm1, %v1415_v25, 0.0 }
 0x316   : > { %v1448_v45 = vadd.f32 %v1447_v4, %v1446_v63  ;;  %v1425_v51 = vadd.f32 %v1424_v62, %v1423_v0 }
 0x318   : > { %v1450_v42 = vadd.f32 %v1449_v36, %v1448_v45  ;;  %v1427_v50 = vadd.f32 %v1426_v46, %v1425_v51 }
 0x31a   : > { %v1452_v5 = vadd.f32 %v1451_v17, %v1450_v42  ;;  %v1429_v15 = vadd.f32 %v1428_v61, %v1427_v50 }
 0x31f   : > { %v2575_v52 = vpop.eup %2574 }
 0x320   : > { %v1384_v56 = vmul.f32 0.6931472, %v2575_v52 }
 0x322   : > { %v1392_v7 = vadd.f32 %v1384_v56, %v1320_v41  ;;  %v3885_v41 = vld [vmem:[%s267_s10] sm:$0xff]  ;;  %s4186_s10 = scalar_lea.hbm %s4305_s4, %s4161_s26 }
 0x324   : > { %v3868_v22 = vsub.f32 %v3765_v59, %v1392_v7  ;;  %v3872_v20 = vsub.f32 %v3763_v11, %v1392_v7 }
 0x326   : > { %v1439_v54 = vmul.f32 %v3868_v22, %v3535_v23  ;;  %v1416_v38 = vmul.f32 %v3872_v20, %v3535_v23 }
 0x328   : > { %v1453_v59 = vsel %vm899_vm1, %v1439_v54, 0.0  ;;  %v1430_v49 = vsel %vm899_vm1, %v1416_v38, 0.0 }
 0x329   : > { %v1454_v47 = vadd.f32 %v1453_v59, %v1452_v5  ;;  %v1431_v11 = vadd.f32 %v1430_v49, %v1429_v15 }
 0x32b   : > { %1488 = vxpose.xlu0.b32.start.end [1/1] (short) (narrow) %v1454_v47, 8  ;;  %1455 = vxpose.xlu1.b32.start.end [1/1] (short) (narrow) %v1431_v11, 8 }
 0x3ab   : > { %v1504_v8 = vpop.trf.xlu0  ;;  %v1471_v34 = vpop.trf.xlu1 }
 0x3ac   : > { %v1520_v14 = vmul.f32 %v1504_v8, %v3556_v9  ;;  %v1487_v52 = vmul.f32 %v1471_v34, %v3556_v9 }
 0x3ae   : > { %v1521_v6 = vadd.f32 %v3885_v41, %v1520_v14 }
 0x3b0   : > { %v1523_v4 = vsub.f32 %v1487_v52, %v1521_v6  ;;  %v1522_v0 = vmax.f32 %v1487_v52, %v1521_v6 }
 0x3b2   : > { %v1524_v44 = vand.u32 2147483647, %v1523_v4 }
 0x3b4   : > { %v1525_v56 = vsub.f32 0.0, %v1524_v44 }
 0x3b6   : > { %v1526_v1 = vmul.f32 1.442695, %v1525_v56 }
 0x3b8   : > { %2576 = vpow2.f32 %v1526_v1 }
 0x3c2   : > { %v2577_v25 = vpop.eup %2576 }
 0x3c3   : > { %v1528_v62 = vadd.f32 1.0, %v2577_v25 }
 0x3c5   : > { %2578 = vlog2.f32 %v1528_v62 }
 0x3cf   : > { %v2579_v63 = vpop.eup %2578 }
 0x3d0   : > { %v1530_v7 = vmul.f32 0.6931472, %v2579_v63 }
 0x3d2   : > { %v1531_v36 = vadd.f32 %v1530_v7, %v1522_v0 }
 0x3d4   : > { %v1533_v46 = vsub.f32 %v1521_v6, %v1531_v36  ;;  %v1532_v45 = vsub.f32 %v1487_v52, %v1531_v36  ;;  %v2684_v6 = vld [vmem:[%s3139_s14] sm:$0xff] }
 0x3d6   : > { %v1608_v9 = vrot.slane %v1533_v46, %v3158_v16  ;;  %v1601_v51 = vrot.slane %v1533_v46, %v3154_v12  ;;  %v1544_v17 = vrot.slane %v1532_v45, %v3158_v16  ;;  %v1537_v61 = vrot.slane %v1532_v45, %v3154_v12 }
 0x3d7   : > { %v1551_v42 = vrot.slane %v1532_v45, %v3165_v21  ;;  %v1615_v50 = vrot.slane %v1533_v46, %v3165_v21  ;;  %v1558_v54 = vrot.slane %v1532_v45, %v3170_v24  ;;  %v1622_v38 = vrot.slane %v1533_v46, %v3170_v24 }
 0x3d8   : > { %1610 = vbcast.lane.b32.xlu1 %v1608_v9, 256  ;;  %1603 = vbcast.lane.b32.xlu0 %v1601_v51, 256  ;;  %v1565_v5 = vrot.slane %v1532_v45, %v3175_v27  ;;  %v1629_v16 = vrot.slane %v1533_v46, %v3175_v27  ;;  %v1572_v12 = vrot.slane %v1532_v45, %v3180_v30 }
 0x3d9   : > { %v1636_v15 = vrot.slane %v1533_v46, %v3180_v30  ;;  %v1579_v21 = vrot.slane %v1532_v45, %v3185_v33  ;;  %v1643_v59 = vrot.slane %v1533_v46, %v3185_v33  ;;  %v1586_v24 = vrot.slane %v1532_v45, %v3190_v37  ;;  %v2683_v33 = vld [vmem:[%s3139_s14 + $0x8] sm:$0xff] }
 0x3da   : > { %v1650_v27 = vrot.slane %v1533_v46, %v3190_v37 }
 0x3dc   : > { %1546 = vbcast.lane.b32.xlu1 %v1544_v17, 256  ;;  %1539 = vbcast.lane.b32.xlu0 %v1537_v61, 256  ;;  %v2685_v17 = vld [vmem:[%s3139_s14 + $0x10] sm:$0xff] }
 0x3e0   : > { %1553 = vbcast.lane.b32.xlu1 %v1551_v42, 256  ;;  %1617 = vbcast.lane.b32.xlu0 %v1615_v50, 256 }
 0x3e4   : > { %1560 = vbcast.lane.b32.xlu1 %v1558_v54, 256  ;;  %1624 = vbcast.lane.b32.xlu0 %v1622_v38, 256 }
 0x3e8   : > { %1567 = vbcast.lane.b32.xlu1 %v1565_v5, 256  ;;  %1631 = vbcast.lane.b32.xlu0 %v1629_v16, 256 }
 0x3ec   : > { %1574 = vbcast.lane.b32.xlu1 %v1572_v12, 256  ;;  %1638 = vbcast.lane.b32.xlu0 %v1636_v15, 256 }
 0x3f0   : > { %1581 = vbcast.lane.b32.xlu1 %v1579_v21, 256  ;;  %1645 = vbcast.lane.b32.xlu0 %v1643_v59, 256 }
 0x3f4   : > { %1588 = vbcast.lane.b32.xlu1 %v1586_v24, 256  ;;  %1652 = vbcast.lane.b32.xlu0 %v1650_v27, 256 }
 0x44a   : > { %v1611_v49 = vpop.permute.xlu1 %1610  ;;  %v1604_v47 = vpop.permute.xlu0 %1603 }
 0x44b   : > { %v3905_v30 = vsub.f32 %v1611_v49, %v3781_v18  ;;  %v3908_v11 = vsub.f32 %v1604_v47, %v3787_v13 }
 0x44d   : > { %v3912_v14 = vadd.f32 %v2683_v33, %v3905_v30  ;;  %v3922_v4 = vadd.f32 %v2684_v6, %v3908_v11 }
 0x44e   : > { %v1547_v8 = vpop.permute.xlu1 %1546  ;;  %v1540_v34 = vpop.permute.xlu0 %1539 }
 0x44f   : > { %v3915_v52 = vsub.f32 %v1547_v8, %v3776_v55  ;;  %v3918_v37 = vsub.f32 %v1540_v34, %v3784_v58  ;;  %v2686_v8 = vld [vmem:[%s3139_s14 + $0x18] sm:$0xff] }
 0x451   : > { %v1671_v18 = vsub.f32 %v3915_v52, %v3905_v30  ;;  %v1759_v13 = vsub.f32 %v3915_v52, %v3912_v14  ;;  %v1670_v44 = vsub.f32 %v3918_v37, %v3908_v11  ;;  %v1758_v55 = vsub.f32 %v3918_v37, %v3922_v4 }
 0x452   : > { %v1554_v56 = vpop.permute.xlu1 %1553  ;;  %v1618_v58 = vpop.permute.xlu0 %1617 }
 0x453   : > { %v1679_v1 = vand.u32 2147483647, %v1671_v18  ;;  %v1767_v25 = vand.u32 2147483647, %v1759_v13  ;;  %v3933_v62 = vsub.f32 %v1554_v56, %v3797_v53  ;;  %v3936_v63 = vsub.f32 %v1618_v58, %v3792_v32 }
 0x454   : > { %v1678_v0 = vand.u32 2147483647, %v1670_v44  ;;  %v1766_v7 = vand.u32 2147483647, %v1758_v55 }
 0x455   : > { %v1687_v36 = vsub.f32 0.0, %v1679_v1  ;;  %v1775_v46 = vsub.f32 0.0, %v1767_v25  ;;  %v1672_v45 = vsub.f32 %v3933_v62, %v3936_v63  ;;  %v3942_v61 = vadd.f32 %v2685_v17, %v3936_v63  ;;  %v2687_v1 = vld [vmem:[%s3139_s14 + $0x20] sm:$0xff] }
 0x456   : > { %v1686_v9 = vsub.f32 0.0, %v1678_v0  ;;  %v1774_v51 = vsub.f32 0.0, %v1766_v7  ;;  %v1561_v42 = vpop.permute.xlu1 %1560  ;;  %v1625_v50 = vpop.permute.xlu0 %1624 }
 0x457   : > { %v1696_v53 = vmul.f32 1.442695, %v1687_v36  ;;  %v1784_v54 = vmul.f32 1.442695, %v1775_v46  ;;  %v1680_v38 = vand.u32 2147483647, %v1672_v45  ;;  %v3945_v32 = vsub.f32 %v1561_v42, %v3808_v60 }
 0x458   : > { %v1694_v5 = vmul.f32 1.442695, %v1686_v9  ;;  %v1782_v16 = vmul.f32 1.442695, %v1774_v51  ;;  %v1760_v12 = vsub.f32 %v3933_v62, %v3942_v61  ;;  %v3950_v21 = vsub.f32 %v1625_v50, %v3811_v26  ;;  %v2688_v51 = vld [vmem:[%s3139_s14 + $0x28] sm:$0xff] }
 0x459   : > { %2580 = vpow2.f32 %v1696_v53  ;;  %v1688_v15 = vsub.f32 0.0, %v1680_v38 }
 0x45a   : > { %2582 = vpow2.f32 %v1784_v54  ;;  %v1768_v59 = vand.u32 2147483647, %v1760_v12  ;;  %v1568_v24 = vpop.permute.xlu1 %1567  ;;  %v1632_v27 = vpop.permute.xlu0 %1631  ;;  %v1673_v60 = vsub.f32 %v3945_v32, %v3950_v21  ;;  %v3956_v34 = vadd.f32 %v2686_v8, %v3950_v21 }
 0x45b   : > { %2584 = vpow2.f32 %v1694_v5  ;;  %v1698_v49 = vmul.f32 1.442695, %v1688_v15  ;;  %v3959_v33 = vsub.f32 %v1568_v24, %v3823_v2  ;;  %v3962_v6 = vsub.f32 %v1632_v27, %v3818_v35 }
 0x45c   : > { %2586 = vpow2.f32 %v1782_v16  ;;  %v1776_v47 = vsub.f32 0.0, %v1768_v59  ;;  %v1681_v26 = vand.u32 2147483647, %v1673_v60  ;;  %v1761_v13 = vsub.f32 %v3945_v32, %v3956_v34 }
 0x45d   : > { %2588 = vpow2.f32 %v1698_v49  ;;  %v1674_v58 = vsub.f32 %v3959_v33, %v3962_v6  ;;  %v3970_v2 = vadd.f32 %v2687_v1, %v3962_v6 }
 0x45e   : > { %v1786_v18 = vmul.f32 1.442695, %v1776_v47  ;;  %v1575_v44 = vpop.permute.xlu1 %1574  ;;  %v1639_v55 = vpop.permute.xlu0 %1638  ;;  %v1689_v56 = vsub.f32 0.0, %v1681_v26  ;;  %v1769_v25 = vand.u32 2147483647, %v1761_v13 }
 0x45f   : > { %v3973_v35 = vsub.f32 %v1575_v44, %v3832_v40  ;;  %v3976_v0 = vsub.f32 %v1639_v55, %v3835_v48  ;;  %v1682_v36 = vand.u32 2147483647, %v1674_v58  ;;  %v1762_v46 = vsub.f32 %v3959_v33, %v3970_v2 }
 0x460   : > { %2590 = vpow2.f32 %v1786_v18  ;;  %v1700_v7 = vmul.f32 1.442695, %v1689_v56  ;;  %v1777_v45 = vsub.f32 0.0, %v1769_v25  ;;  %v2689_v25 = vld [vmem:[%s3139_s14 + $0x30] sm:$0xff] }
 0x461   : > { %v1675_v9 = vsub.f32 %v3973_v35, %v3976_v0  ;;  %v3984_v17 = vadd.f32 %v2688_v51, %v3976_v0  ;;  %v1770_v53 = vand.u32 2147483647, %v1762_v46  ;;  %v1690_v38 = vsub.f32 0.0, %v1682_v36 }
 0x462   : > { %v1582_v42 = vpop.permute.xlu1 %1581  ;;  %v1646_v50 = vpop.permute.xlu0 %1645  ;;  %2592 = vpow2.f32 %v1700_v7  ;;  %v1788_v15 = vmul.f32 1.442695, %v1777_v45 }
 0x463   : > { %v2581_v40 = vpop.eup %2580  ;;  %v1683_v5 = vand.u32 2147483647, %v1675_v9  ;;  %v1763_v59 = vsub.f32 %v3973_v35, %v3984_v17  ;;  %v3989_v24 = vsub.f32 %v1582_v42, %v3846_v10  ;;  %v1778_v60 = vsub.f32 0.0, %v1770_v53 }
 0x464   : > { %v2583_v54 = vpop.eup %2582  ;;  %v1711_v48 = vadd.f32 1.0, %v2581_v40  ;;  %v3992_v47 = vsub.f32 %v1646_v50, %v3843_v3  ;;  %v1702_v58 = vmul.f32 1.442695, %v1690_v38  ;;  %v2690_v38 = vld [vmem:[%s3139_s14 + $0x38] sm:$0xff]  ;;  %s2921_s14 = smov [#allocation8]  }
 0x465   : > { %v2585_v16 = vpop.eup %2584  ;;  %v1799_v12 = vadd.f32 1.0, %v2583_v54  ;;  %v1691_v18 = vsub.f32 0.0, %v1683_v5  ;;  %v1771_v13 = vand.u32 2147483647, %v1763_v59  ;;  %v1790_v36 = vmul.f32 1.442695, %v1778_v60 }
 0x466   : > { %v2587_v27 = vpop.eup %2586  ;;  %2594 = vlog2.f32 %v1711_v48  ;;  %v1710_v49 = vadd.f32 1.0, %v2585_v16  ;;  %v1589_v44 = vpop.permute.xlu1 %1588  ;;  %v1676_v1 = vsub.f32 %v3989_v24, %v3992_v47  ;;  %v3998_v7 = vadd.f32 %v2689_v25, %v3992_v47 }
 0x467   : > { %v2589_v8 = vpop.eup %2588  ;;  %2596 = vlog2.f32 %v1799_v12  ;;  %v1798_v26 = vadd.f32 1.0, %v2587_v27  ;;  %v1653_v55 = vpop.permute.xlu0 %1652  ;;  %v1779_v10 = vsub.f32 0.0, %v1771_v13  ;;  %v4001_v46 = vsub.f32 %v1589_v44, %v3872_v20 }
 0x468   : > { %2598 = vlog2.f32 %v1710_v49  ;;  %v1712_v56 = vadd.f32 1.0, %v2589_v8  ;;  %v4004_v45 = vsub.f32 %v1653_v55, %v3868_v22  ;;  %v1704_v51 = vmul.f32 1.442695, %v1691_v18 }
 0x469   : > { %2600 = vlog2.f32 %v1798_v26  ;;  %v1684_v42 = vand.u32 2147483647, %v1676_v1  ;;  %v1764_v50 = vsub.f32 %v3989_v24, %v3998_v7  ;;  %v1792_v40 = vmul.f32 1.442695, %v1779_v10 }
 0x46a   : > { %v2591_v3 = vpop.eup %2590  ;;  %2602 = vlog2.f32 %v1712_v56  ;;  %v1677_v54 = vsub.f32 %v4001_v46, %v4004_v45  ;;  %v4012_v5 = vadd.f32 %v2690_v38, %v4004_v45 }
 0x46b   : > { %v1800_v9 = vadd.f32 1.0, %v2591_v3  ;;  %2604 = vpow2.f32 %v1788_v15  ;;  %v1692_v53 = vsub.f32 0.0, %v1684_v42  ;;  %v1772_v48 = vand.u32 2147483647, %v1764_v50 }
 0x46c   : > { %2606 = vpow2.f32 %v1702_v58  ;;  %v2593_v20 = vpop.eup %2592  ;;  %v1685_v15 = vand.u32 2147483647, %v1677_v54  ;;  %v1765_v18 = vsub.f32 %v4001_v46, %v4012_v5  ;;  %v1663_v58 = vmax.f32 %v3915_v52, %v3905_v30 }
 0x46d   : > { %2608 = vlog2.f32 %v1800_v9  ;;  %v1706_v22 = vmul.f32 1.442695, %v1692_v53  ;;  %v1780_v12 = vsub.f32 0.0, %v1772_v48  ;;  %v1713_v27 = vadd.f32 1.0, %v2593_v20 }
 0x46e   : > { %2610 = vpow2.f32 %v1790_v36  ;;  %v1693_v55 = vsub.f32 0.0, %v1685_v15  ;;  %v1751_v3 = vmax.f32 %v3915_v52, %v3912_v14  ;;  %v1662_v36 = vmax.f32 %v3918_v37, %v3908_v11 }
 0x46f   : > { %2612 = vpow2.f32 %v1704_v51  ;;  %v1794_v60 = vmul.f32 1.442695, %v1780_v12  ;;  %v1750_v9 = vmax.f32 %v3918_v37, %v3922_v4  ;;  %v1752_v30 = vmax.f32 %v3933_v62, %v3942_v61 }
 0x470   : > { %v2595_v16 = vpop.eup %2594  ;;  %2614 = vpow2.f32 %v1792_v40  ;;  %v1773_v53 = vand.u32 2147483647, %v1765_v18  ;;  %v1708_v52 = vmul.f32 1.442695, %v1693_v55  ;;  %v1664_v4 = vmax.f32 %v3933_v62, %v3936_v63 }
 0x471   : > { %v2597_v59 = vpop.eup %2596  ;;  %2616 = vpow2.f32 %v1706_v22  ;;  %v1721_v26 = vmul.f32 0.6931472, %v2595_v16 }
 0x472   : > { %v2599_v49 = vpop.eup %2598  ;;  %v1809_v44 = vmul.f32 0.6931472, %v2597_v59  ;;  %2618 = vpow2.f32 %v1794_v60 }
 0x473   : > { %v2601_v8 = vpop.eup %2600  ;;  %v1719_v10 = vmul.f32 0.6931472, %v2599_v49  ;;  %2620 = vlog2.f32 %v1713_v27  ;;  %v4024_v50 = vadd.f32 %v1721_v26, %v1663_v58  ;;  %v1781_v49 = vsub.f32 0.0, %v1773_v53 }
 0x474   : > { %v2603_v13 = vpop.eup %2602  ;;  %v1807_v1 = vmul.f32 0.6931472, %v2601_v8  ;;  %v4028_v20 = vadd.f32 %v1809_v44, %v1751_v3 }
 0x475   : > { %v2605_v56 = vpop.eup %2604  ;;  %v1723_v48 = vmul.f32 0.6931472, %v2603_v13  ;;  %v4030_v11 = vadd.f32 %v1719_v10, %v1662_v36  ;;  %v1665_v36 = vmax.f32 %v3945_v32, %v3950_v21 }
 0x476   : > { %v2607_v25 = vpop.eup %2606  ;;  %v1801_v51 = vadd.f32 1.0, %v2605_v56  ;;  %v4032_v38 = vadd.f32 %v1807_v1, %v1750_v9  ;;  %v1839_v59 = vsub.f32 %v4024_v50, %v4028_v20  ;;  %v1796_v56 = vmul.f32 1.442695, %v1781_v49 }
 0x477   : > { %v2609_v42 = vpop.eup %2608  ;;  %v1714_v40 = vadd.f32 1.0, %v2607_v25  ;;  %v4040_v27 = vadd.f32 %v1723_v48, %v1664_v4  ;;  %v1753_v9 = vmax.f32 %v3945_v32, %v3956_v34 }
 0x478   : > { %v2611_v54 = vpop.eup %2610  ;;  %v1811_v14 = vmul.f32 0.6931472, %v2609_v42  ;;  %2622 = vlog2.f32 %v1801_v51  ;;  %v1838_v60 = vsub.f32 %v4030_v11, %v4032_v38  ;;  %v1847_v44 = vand.u32 2147483647, %v1839_v59 }
 0x479   : > { %v2613_v22 = vpop.eup %2612  ;;  %v1802_v37 = vadd.f32 1.0, %v2611_v54  ;;  %2624 = vlog2.f32 %v1714_v40  ;;  %v1666_v40 = vmax.f32 %v3959_v33, %v3962_v6 }
 0x47a   : > { %v2615_v61 = vpop.eup %2614  ;;  %v4036_v16 = vadd.f32 %v1811_v14, %v1752_v30  ;;  %v1715_v12 = vadd.f32 1.0, %v2613_v22  ;;  %v1846_v55 = vand.u32 2147483647, %v1838_v60  ;;  %v1855_v3 = vsub.f32 0.0, %v1847_v44 }
 0x47b   : > { %2626 = vlog2.f32 %v1802_v37  ;;  %v2617_v15 = vpop.eup %2616  ;;  %v1803_v8 = vadd.f32 1.0, %v2615_v61 }
 0x47c   : > { %2628 = vpow2.f32 %v1708_v52  ;;  %v1716_v62 = vadd.f32 1.0, %v2617_v15  ;;  %v2619_v63 = vpop.eup %2618  ;;  %v1840_v18 = vsub.f32 %v4040_v27, %v4036_v16  ;;  %v1854_v30 = vsub.f32 0.0, %v1846_v55 }
 0x47d   : > { %2630 = vlog2.f32 %v1715_v12  ;;  %v2621_v26 = vpop.eup %2620  ;;  %v1804_v13 = vadd.f32 1.0, %v2619_v63  ;;  %v1754_v52 = vmax.f32 %v3959_v33, %v3970_v2  ;;  %v1864_v32 = vmul.f32 1.442695, %v1855_v3 }
 0x47e   : > { %2632 = vlog2.f32 %v1803_v8  ;;  %v1725_v58 = vmul.f32 0.6931472, %v2621_v26  ;;  %v1848_v1 = vand.u32 2147483647, %v1840_v18  ;;  %v1862_v12 = vmul.f32 1.442695, %v1854_v30 }
 0x47f   : > { %2634 = vlog2.f32 %v1716_v62  ;;  %v1667_v15 = vmax.f32 %v3973_v35, %v3976_v0  ;;  %v1755_v2 = vmax.f32 %v3973_v35, %v3984_v17  ;;  %v1668_v26 = vmax.f32 %v3989_v24, %v3992_v47 }
 0x480   : > { %2636 = vlog2.f32 %v1804_v13  ;;  %v4052_v48 = vadd.f32 %v1725_v58, %v1665_v36  ;;  %v1856_v37 = vsub.f32 0.0, %v1848_v1  ;;  %v1756_v18 = vmax.f32 %v3989_v24, %v3998_v7 }
 0x481   : > { %2638 = vpow2.f32 %v1796_v56 }
 0x482   : > { %v2623_v10 = vpop.eup %2622  ;;  %v1866_v62 = vmul.f32 1.442695, %v1856_v37  ;;  %2640 = vpow2.f32 %v1864_v32 }
 0x483   : > { %v2625_v25 = vpop.eup %2624  ;;  %v1813_v51 = vmul.f32 0.6931472, %v2623_v10  ;;  %2642 = vpow2.f32 %v1862_v12 }
 0x484   : > { %v1727_v53 = vmul.f32 0.6931472, %v2625_v25 }
 0x485   : > { %v2627_v42 = vpop.eup %2626  ;;  %v4054_v14 = vadd.f32 %v1813_v51, %v1753_v9 }
 0x486   : > { %v2629_v54 = vpop.eup %2628  ;;  %v1815_v21 = vmul.f32 0.6931472, %v2627_v42  ;;  %v4060_v4 = vadd.f32 %v1727_v53, %v1666_v40 }
 0x487   : > { %v2631_v22 = vpop.eup %2630  ;;  %v1841_v34 = vsub.f32 %v4052_v48, %v4054_v14  ;;  %v1717_v60 = vadd.f32 1.0, %v2629_v54 }
 0x488   : > { %v4062_v6 = vadd.f32 %v1815_v21, %v1754_v52  ;;  %v2633_v61 = vpop.eup %2632  ;;  %v1729_v59 = vmul.f32 0.6931472, %v2631_v22 }
 0x489   : > { %v1849_v49 = vand.u32 2147483647, %v1841_v34  ;;  %v2635_v8 = vpop.eup %2634  ;;  %v1817_v63 = vmul.f32 0.6931472, %v2633_v61  ;;  %2644 = vlog2.f32 %v1717_v60 }
 0x48a   : > { %v1842_v33 = vsub.f32 %v4060_v4, %v4062_v6  ;;  %v2637_v13 = vpop.eup %2636  ;;  %v1731_v55 = vmul.f32 0.6931472, %v2635_v8  ;;  %v4074_v56 = vadd.f32 %v1729_v59, %v1667_v15  ;;  %2646 = vpow2.f32 %v1866_v62 }
 0x48b   : > { %v1857_v0 = vsub.f32 0.0, %v1849_v49  ;;  %v4076_v58 = vadd.f32 %v1817_v63, %v1755_v2  ;;  %v1819_v35 = vmul.f32 0.6931472, %v2637_v13  ;;  %v2639_v1 = vpop.eup %2638  ;;  %v1669_v49 = vmax.f32 %v4001_v46, %v4004_v45 }
 0x48c   : > { %v1850_v44 = vand.u32 2147483647, %v1842_v33  ;;  %v4080_v24 = vadd.f32 %v1731_v55, %v1668_v26  ;;  %v1805_v3 = vadd.f32 1.0, %v2639_v1  ;;  %v2641_v53 = vpop.eup %2640  ;;  %v1757_v33 = vmax.f32 %v4001_v46, %v4012_v5 }
 0x48d   : > { %v1868_v17 = vmul.f32 1.442695, %v1857_v0  ;;  %v1843_v47 = vsub.f32 %v4074_v56, %v4076_v58  ;;  %v4082_v7 = vadd.f32 %v1819_v35, %v1756_v18  ;;  %v2643_v54 = vpop.eup %2642  ;;  %v1879_v37 = vadd.f32 1.0, %v2641_v53 }
 0x48e   : > { %v1858_v10 = vsub.f32 0.0, %v1850_v44  ;;  %v1878_v32 = vadd.f32 1.0, %v2643_v54 }
 0x48f   : > { %2648 = vpow2.f32 %v1868_v17  ;;  %v1851_v36 = vand.u32 2147483647, %v1843_v47  ;;  %v1844_v9 = vsub.f32 %v4080_v24, %v4082_v7  ;;  %v1831_v47 = vmax.f32 %v4024_v50, %v4028_v20 }
 0x490   : > { %v1870_v25 = vmul.f32 1.442695, %v1858_v10 }
 0x491   : > { %v1859_v51 = vsub.f32 0.0, %v1851_v36  ;;  %v1852_v42 = vand.u32 2147483647, %v1844_v9 }
 0x492   : > { %2650 = vpow2.f32 %v1870_v25 }
 0x493   : > { %2652 = vlog2.f32 %v1805_v3  ;;  %v1872_v30 = vmul.f32 1.442695, %v1859_v51  ;;  %v1860_v40 = vsub.f32 0.0, %v1852_v42  ;;  %v2645_v21 = vpop.eup %2644  ;;  %v1830_v3 = vmax.f32 %v4030_v11, %v4032_v38 }
 0x494   : > { %v2647_v22 = vpop.eup %2646  ;;  %v1733_v15 = vmul.f32 0.6931472, %v2645_v21 }
 0x495   : > { %2654 = vpow2.f32 %v1872_v30  ;;  %v1874_v52 = vmul.f32 1.442695, %v1860_v40  ;;  %v1880_v12 = vadd.f32 1.0, %v2647_v22  ;;  %v1832_v30 = vmax.f32 %v4040_v27, %v4036_v16 }
 0x496   : > { %v4090_v62 = vadd.f32 %v1733_v15, %v1669_v49  ;;  %v1833_v22 = vmax.f32 %v4052_v48, %v4054_v14 }
 0x497   : > { %2656 = vpow2.f32 %v1874_v52 }
 0x498   : > { %2658 = vlog2.f32 %v1879_v37 }
 0x499   : > { %v2649_v34 = vpop.eup %2648  ;;  %2660 = vlog2.f32 %v1878_v32 }
 0x49a   : > { %v1881_v60 = vadd.f32 1.0, %v2649_v34  ;;  %2662 = vlog2.f32 %v1880_v12  ;;  %v1834_v12 = vmax.f32 %v4060_v4, %v4062_v6 }
 0x49c   : > { %v2651_v61 = vpop.eup %2650  ;;  %2664 = vlog2.f32 %v1881_v60 }
 0x49d   : > { %v2653_v59 = vpop.eup %2652  ;;  %v1882_v8 = vadd.f32 1.0, %v2651_v61 }
 0x49e   : > { %v1821_v2 = vmul.f32 0.6931472, %v2653_v59 }
 0x49f   : > { %v2655_v26 = vpop.eup %2654  ;;  %2666 = vlog2.f32 %v1882_v8 }
 0x4a0   : > { %v4092_v63 = vadd.f32 %v1821_v2, %v1757_v33  ;;  %v1883_v0 = vadd.f32 1.0, %v2655_v26 }
 0x4a1   : > { %v2657_v13 = vpop.eup %2656 }
 0x4a2   : > { %v1845_v18 = vsub.f32 %v4090_v62, %v4092_v63  ;;  %v1884_v44 = vadd.f32 1.0, %v2657_v13  ;;  %v2659_v46 = vpop.eup %2658  ;;  %2668 = vlog2.f32 %v1883_v0 }
 0x4a3   : > { %v2661_v5 = vpop.eup %2660  ;;  %v1889_v10 = vmul.f32 0.6931472, %v2659_v46 }
 0x4a4   : > { %v1853_v45 = vand.u32 2147483647, %v1845_v18  ;;  %2670 = vlog2.f32 %v1884_v44  ;;  %v2663_v17 = vpop.eup %2662  ;;  %v1887_v1 = vmul.f32 0.6931472, %v2661_v5 }
 0x4a5   : > { %v1891_v36 = vmul.f32 0.6931472, %v2663_v17  ;;  %v1903_v51 = vadd.f32 %v1889_v10, %v1831_v47 }
 0x4a6   : > { %v1861_v55 = vsub.f32 0.0, %v1853_v45  ;;  %v2665_v25 = vpop.eup %2664  ;;  %v1902_v42 = vadd.f32 %v1887_v1, %v1830_v3  ;;  %v1836_v45 = vmax.f32 %v4080_v24, %v4082_v7 }
 0x4a7   : > { %v1893_v40 = vmul.f32 0.6931472, %v2665_v25  ;;  %v1904_v54 = vadd.f32 %v1891_v36, %v1832_v30  ;;  %v1911_v21 = vsub.f32 %v4024_v50, %v1903_v51  ;;  %v1919_v32 = vsub.f32 %v4028_v20, %v1903_v51 }
 0x4a8   : > { %v1876_v35 = vmul.f32 1.442695, %v1861_v55  ;;  %v1910_v34 = vsub.f32 %v4030_v11, %v1902_v42  ;;  %v1918_v61 = vsub.f32 %v4032_v38, %v1902_v42  ;;  %v1835_v20 = vmax.f32 %v4074_v56, %v4076_v58 }
 0x4a9   : > { %v2667_v9 = vpop.eup %2666  ;;  %v1905_v59 = vadd.f32 %v1893_v40, %v1833_v22  ;;  %v1920_v33 = vsub.f32 %v4036_v16, %v1904_v54  ;;  %v1927_v60 = vmul.f32 %v1911_v21, %v3436_v57  ;;  %v1912_v8 = vsub.f32 %v4040_v27, %v1904_v54 }
 0x4aa   : > { %2672 = vpow2.f32 %v1876_v35  ;;  %v1895_v52 = vmul.f32 0.6931472, %v2667_v9  ;;  %v1950_v38 = vmul.f32 %v1919_v32, %v3436_v57  ;;  %v1926_v26 = vmul.f32 %v1910_v34, %v3434_v19 }
 0x4ab   : > { %v1949_v18 = vmul.f32 %v1918_v61, %v3434_v19  ;;  %v1913_v13 = vsub.f32 %v4052_v48, %v1905_v59  ;;  %v1921_v16 = vsub.f32 %v4054_v14, %v1905_v59  ;;  %v1951_v27 = vmul.f32 %v1920_v33, %v3450_v28 }
 0x4ac   : > { %v2669_v53 = vpop.eup %2668  ;;  %v1906_v2 = vadd.f32 %v1895_v52, %v1834_v12  ;;  %v1928_v55 = vmul.f32 %v1912_v8, %v3450_v28  ;;  %v1958_v5 = vsel %vm899_vm1, %v1950_v38, 0.0  ;;  %v1934_v48 = vsel %vm899_vm1, %v1926_v26, 0.0  ;;  %v2691_v26 = vld [vmem:[%s285_s28] sm:$0xff]  ;;  %s2786_s28 = sshll.u32 %s2921_s14, 4  ;;  %s2787_s28 = int_to_ptr.vmem [resolvable:$false] %s2786_s28 }
 0x4ad   : > { %v1897_v49 = vmul.f32 0.6931472, %v2669_v53  ;;  %v1957_v19 = vsel %vm899_vm1, %v1949_v18, 0.0  ;;  %v1935_v14 = vsel %vm899_vm1, %v1927_v60, 0.0  ;;  %v1929_v35 = vmul.f32 %v1913_v13, %v3459_v31  ;;  %s2788_s6 = scalar_lea.vmem %s2787_s28, 256  ;;  %p2789_p6 = scmp.lt.s32.totalorder %s4177_s17, %s2787_s28 }
 0x4ae   : > { %v2671_v37 = vpop.eup %2670  ;;  %v1922_v44 = vsub.f32 %v4062_v6, %v1906_v2  ;;  %v1914_v57 = vsub.f32 %v4060_v4, %v1906_v2  ;;  %v1952_v6 = vmul.f32 %v1921_v16, %v3459_v31  ;;  %v1960_v4 = vsel %vm899_vm1, %v1951_v27, 0.0  ;;  %p2790_p12 = scmp.lt.s32.totalorder %s2788_s6, %s2782_s8 }
 0x4af   : > { %v1899_v11 = vmul.f32 0.6931472, %v2671_v37  ;;  %v1907_v0 = vadd.f32 %v1897_v49, %v1835_v20  ;;  %v1937_v3 = vsel %vm899_vm1, %v1928_v55, 0.0  ;;  %v1959_v36 = vadd.f32 %v1958_v5, %v1957_v19 }
 0x4b0   : > { %v1953_v28 = vmul.f32 %v1922_v44, %v4336_v43  ;;  %v1930_v25 = vmul.f32 %v1914_v57, %v4336_v43  ;;  %v1936_v9 = vadd.f32 %v1935_v14, %v1934_v48  ;;  %v1939_v51 = vsel %vm899_vm1, %v1929_v35, 0.0  ;;  %p2791_p0 = por %p2790_p12, %p2789_p6 }
 0x4b1   : > { %v1908_v46 = vadd.f32 %v1899_v11, %v1836_v45  ;;  %v1915_v17 = vsub.f32 %v4074_v56, %v1907_v0  ;;  %v1923_v10 = vsub.f32 %v4076_v58, %v1907_v0  ;;  %v1962_v58 = vsel %vm899_vm1, %v1952_v6, 0.0 }
 0x4b2   : > { %v1961_v30 = vadd.f32 %v1960_v4, %v1959_v36  ;;  %v1938_v43 = vadd.f32 %v1937_v3, %v1936_v9  ;;  %v1941_v52 = vsel %vm899_vm1, %v1930_v25, 0.0  ;;  %p2792_p8 = pnand %p2791_p0, %p2785_p9 }
 0x4b3   : > { %v1924_v1 = vsub.f32 %v4082_v7, %v1908_v46  ;;  %v1916_v47 = vsub.f32 %v4080_v24, %v1908_v46  ;;  %v1954_v56 = vmul.f32 %v1923_v10, %v4337_v39  ;;  %v1931_v31 = vmul.f32 %v1915_v17, %v4337_v39 }
 0x4b4   : > { %v2673_v15 = vpop.eup %2672  ;;  %v1837_v7 = vmax.f32 %v4090_v62, %v4092_v63  ;;  %v1964_v24 = vsel %vm899_vm1, %v1953_v28, 0.0  ;;  %v1963_v21 = vadd.f32 %v1962_v58, %v1961_v30  ;;  %v1940_v22 = vadd.f32 %v1939_v51, %v1938_v43 }
 0x4b5   : > { %v1885_v50 = vadd.f32 1.0, %v2673_v15  ;;  %v1955_v53 = vmul.f32 %v1924_v1, %v3487_v29  ;;  %v1932_v54 = vmul.f32 %v1916_v47, %v3487_v29  ;;  %v1966_v37 = vsel %vm899_vm1, %v1954_v56, 0.0 }
 0x4b6   : > { %v1943_v32 = vsel %vm899_vm1, %v1931_v31, 0.0  ;;  %v1965_v34 = vadd.f32 %v1964_v24, %v1963_v21  ;;  %v1942_v61 = vadd.f32 %v1941_v52, %v1940_v22 }
 0x4b7   : > { %2674 = vlog2.f32 %v1885_v50  ;;  %v1968_v15 = vsel %vm899_vm1, %v1955_v53, 0.0  ;;  %v1945_v29 = vsel %vm899_vm1, %v1932_v54, 0.0 }
 0x4b8   : > { %v1967_v49 = vadd.f32 %v1966_v37, %v1965_v34  ;;  %v1944_v33 = vadd.f32 %v1943_v32, %v1942_v61 }
 0x4ba   : > { %v1969_v60 = vadd.f32 %v1968_v15, %v1967_v49  ;;  %v1946_v8 = vadd.f32 %v1945_v29, %v1944_v33 }
 0x4c1   : > { %v2675_v42 = vpop.eup %2674 }
 0x4c2   : > { %v1901_v40 = vmul.f32 0.6931472, %v2675_v42 }
 0x4c4   : > { %v1909_v39 = vadd.f32 %v1901_v40, %v1837_v7 }
 0x4c6   : > { %v1925_v12 = vsub.f32 %v4092_v63, %v1909_v39  ;;  %v1917_v59 = vsub.f32 %v4090_v62, %v1909_v39 }
 0x4c8   : > { %v1956_v2 = vmul.f32 %v1925_v12, %v3535_v23  ;;  %v1933_v50 = vmul.f32 %v1917_v59, %v3535_v23 }
 0x4ca   : > { %v1970_v63 = vsel %vm899_vm1, %v1956_v2, 0.0  ;;  %v1947_v20 = vsel %vm899_vm1, %v1933_v50, 0.0 }
 0x4cb   : > { %v1971_v11 = vadd.f32 %v1970_v63, %v1969_v60  ;;  %v1948_v38 = vadd.f32 %v1947_v20, %v1946_v8 }
 0x4cd   : > { %2005 = vxpose.xlu0.b32.start.end [1/1] (short) (narrow) %v1971_v11, 8  ;;  %1972 = vxpose.xlu1.b32.start.end [1/1] (short) (narrow) %v1948_v38, 8 }
 0x54d   : > { %v2021_v62 = vpop.trf.xlu0  ;;  %v1988_v23 = vpop.trf.xlu1 }
 0x54e   : > { %v2037_v18 = vmul.f32 %v2691_v26, %v2021_v62  ;;  %v4169_v13 = vmul.f32 %v2691_v26, %v1988_v23 }
 0x550   : > { %v4180_v16 = vadd.f32 %v3885_v41, %v2037_v18  ;;  %2039 = vst.msk [vmem:[%s317_s15] sm:$0xff] %vm899_vm1, %v4169_v13 }
 0x551   : > { %2795 = shalt.err (!%p2792_p8)
}
 0x552   : > { %s2796_s25 = scalar_lea.hbm %s4175_s9, 128  ;;  %s2800_s11 = scalar_lea.hbm %s4304_s3, 256 }
 0x553   : > { %p2797_p13 = scmp.ne.s32.totalorder %s4175_s9, %s2796_s25  ;;  %p2801_p3 = scmp.lt.u32.totalorder %s4175_s9, %s4304_s3 }
 0x554   : > { %p2802_p4 = scmp.lt.u32.totalorder %s2800_s11, %s2796_s25  ;;  %p2804_p10 = scmp.lt.u32.totalorder %s2796_s25, %s4175_s9 }
 0x555   : > { %p2798_p11 = pnand %p2797_p13, %p4338_p5 }
 0x556   : > { %p2803_p2 = por %p2802_p4, %p2801_p3 }
 0x557   : > { %p2799_p1 = pneg %p2798_p11 }
 0x558   : > { %p2805_p7 = por %p2804_p10, %p2803_p2 }
 0x55a   : > { %p2806_p9 = pnand %p2805_p7, %p2799_p1 }
 0x55c   : > { %2809 = shalt.err (!%p2806_p9)
}
 0x55d   : > { %2312 = dma.vmem_to_hbm [thread:$0]  (%p4338_p5), %s4177_s17, 128, %s4175_s9, %s2056_s16   ;;  %v2042_v41 = vsub.f32 %v4169_v13, %v4180_v16  ;;  %2040 = vst.msk [vmem:[%s324_s1] sm:$0xff] %vm899_vm1, %v4180_v16 }
 0x55e   : > { %s4222_s8 = scalar_lea.sflag [#allocation10], %s272_s7  ;;  %s2810_s28 = scalar_lea.vmem %s4188_s23, 128 }
 0x55f   : > { %p2811_p6 = scmp.ne.s32.totalorder %s4188_s23, %s2810_s28  ;;  %s2922_s6 = smov [#allocation9]  }
 0x560   : > { %s2814_s25 = sshll.u32 %s2922_s6, 4  ;;  %s2815_s25 = int_to_ptr.vmem [resolvable:$false] %s2814_s25 }
 0x561   : > { %p2812_p12 = pnand %p2811_p6, %p4338_p5  ;;  %s2816_s15 = scalar_lea.vmem %s2815_s25, 256 }
 0x562   : > { %p2817_p8 = scmp.lt.s32.totalorder %s4188_s23, %s2815_s25  ;;  %p2818_p13 = scmp.lt.s32.totalorder %s2816_s15, %s2810_s28 }
 0x563   : > { %p2813_p0 = pneg %p2812_p12 }
 0x564   : > { %p2819_p11 = por %p2818_p13, %p2817_p8 }
 0x566   : > { %p2820_p1 = pnand %p2819_p11, %p2813_p0 }
 0x568   : > { %2823 = shalt.err (!%p2820_p1)
}
 0x569   : > { %s2824_s22 = scalar_lea.hbm %s4186_s10, 128  ;;  %s2828_s1 = scalar_lea.hbm %s4305_s4, 256 }
 0x56a   : > { %p2825_p3 = scmp.ne.s32.totalorder %s4186_s10, %s2824_s22  ;;  %p2829_p10 = scmp.lt.u32.totalorder %s4186_s10, %s4305_s4 }
 0x56b   : > { %p2830_p7 = scmp.lt.u32.totalorder %s2828_s1, %s2824_s22  ;;  %p2832_p6 = scmp.lt.u32.totalorder %s2824_s22, %s4186_s10 }
 0x56c   : > { %p2826_p4 = pnand %p2825_p3, %p4338_p5 }
 0x56d   : > { %p2831_p9 = por %p2830_p7, %p2829_p10 }
 0x56e   : > { %p2827_p2 = pneg %p2826_p4 }
 0x56f   : > { %p2833_p12 = por %p2832_p6, %p2831_p9 }
 0x571   : > { %p2834_p0 = pnand %p2833_p12, %p2827_p2 }
 0x573   : > { %2837 = shalt.err (!%p2834_p0)
}
 0x574   : > { %2313 = dma.vmem_to_hbm [thread:$0]  (%p4338_p5), %s4188_s23, 128, %s4186_s10, %s4222_s8   ;;  %v2043_v0 = vand.u32 2147483647, %v2042_v41  ;;  %v2041_v46 = vmax.f32 %v4169_v13, %v4180_v16 }
 0x575   : > { %s331_s23 = scalar_lea.vmem [#allocation11], %s3127_s27  ;;  %s4254_s13 = scalar_lea.hbm %s4306_s5, %s4161_s26 }
 0x576   : > { %v2044_v45 = vsub.f32 0.0, %v2043_v0  ;;  %s2105_s10 = sshll.u32 %s331_s23, 4  ;;  %s2923_s27 = smov [#allocation11]   ;;  %s4256_s10 = int_to_ptr.vmem [resolvable:$true] %s2105_s10 }
 0x577   : > { %s2838_s14 = scalar_lea.vmem %s4256_s10, 128  ;;  %s2842_s28 = sshll.u32 %s2923_s27, 4  ;;  %s2843_s28 = int_to_ptr.vmem [resolvable:$false] %s2842_s28 }
 0x578   : > { %v2045_v27 = vmul.f32 1.442695, %v2044_v45  ;;  %p2839_p8 = scmp.ne.s32.totalorder %s4256_s10, %s2838_s14  ;;  %s2844_s6 = scalar_lea.vmem %s2843_s28, 256 }
 0x579   : > { %p2845_p1 = scmp.lt.s32.totalorder %s4256_s10, %s2843_s28  ;;  %p2846_p3 = scmp.lt.s32.totalorder %s2844_s6, %s2838_s14 }
 0x57a   : > { %2676 = vpow2.f32 %v2045_v27  ;;  %p2840_p13 = pnand %p2839_p8, %p4338_p5 }
 0x57b   : > { %p2847_p4 = por %p2846_p3, %p2845_p1 }
 0x57c   : > { %p2841_p11 = pneg %p2840_p13 }
 0x57e   : > { %p2848_p2 = pnand %p2847_p4, %p2841_p11 }
 0x584   : > { %v2677_v44 = vpop.eup %2676 }
 0x585   : > { %v2047_v55 = vadd.f32 1.0, %v2677_v44 }
 0x587   : > { %2678 = vlog2.f32 %v2047_v55 }
 0x591   : > { %v2679_v57 = vpop.eup %2678 }
 0x592   : > { %v2049_v19 = vmul.f32 0.6931472, %v2679_v57 }
 0x594   : > { %v2050_v5 = vadd.f32 %v2049_v19, %v2041_v46 }
 0x596   : > { %v2051_v48 = vsub.f32 %v4180_v16, %v2050_v5 }
 0x598   : > { %v2052_v14 = vmul.f32 1.442695, %v2051_v48 }
 0x59a   : > { %2680 = vpow2.f32 %v2052_v14 }
 0x5a4   : > { %v2681_v35 = vpop.eup %2680 }
 0x5a5   : > { %2054 = vst.msk [vmem:[%s331_s23] sm:$0xff] %vm899_vm1, %v2681_v35 }
 0x5a6   : > { %2851 = shalt.err (!%p2848_p2)
}
 0x5a7   : > { %s2852_s26 = scalar_lea.hbm %s4254_s13, 128  ;;  %s2856_s22 = scalar_lea.hbm %s4306_s5, 256 }
 0x5a8   : > { %p2853_p10 = scmp.ne.s32.totalorder %s4254_s13, %s2852_s26  ;;  %p2857_p6 = scmp.lt.u32.totalorder %s4254_s13, %s4306_s5 }
 0x5a9   : > { %p2858_p12 = scmp.lt.u32.totalorder %s2856_s22, %s2852_s26  ;;  %p2860_p8 = scmp.lt.u32.totalorder %s2852_s26, %s4254_s13 }
 0x5aa   : > { %p2854_p7 = pnand %p2853_p10, %p4338_p5 }
 0x5ab   : > { %p2859_p0 = por %p2858_p12, %p2857_p6 }
 0x5ac   : > { %p2855_p9 = pneg %p2854_p7 }
 0x5ad   : > { %p2861_p13 = por %p2860_p8, %p2859_p0 }
 0x5af   : > { %p2862_p11 = pnand %p2861_p13, %p2855_p9 }
 0x5b1   : > { %2865 = shalt.err (!%p2862_p11)
}
 0x5b2   : > { %2314 = dma.vmem_to_hbm [thread:$0]  (%p4338_p5), %s4256_s10, 128, %s4254_s13, %s4222_s8  }
 0x5b3 PF: > { %s2117_s1 = sand.u32 1, %s2900_s18   ;;  %p4339_p1 = scmp.ne.s32.totalorder %s4322_s30, 0 }
 0x5b4   : > { %p4340_p3 = scmp.ge.s32.totalorder %s2912_s21, 2  ;;  %s2118_s9 = scalar_lea.sflag [#allocation4], %s2117_s1 }
 0x5b6   : > { %p2329_p4 = pnand %p4340_p3, %p4339_p1 }
 0x5b8   : > { %2891 = dma.done.wait (!%p2329_p4), %s2118_s9, 128  }
 0x5b9   : > { %2893 = vsyncadd (!%p2329_p4), %s2118_s9, 4294967168  ;;  %s4341_s16 = sadd.s32 4294967294, %s2912_s21  }
 0x5ba   : > { %s2126_s23 = sand.u32 1, %s4341_s16  }
 0x5bb   : > { %s2127_s12 = scalar_lea.sflag [#allocation10], %s2126_s23 }
 0x5bc   : > { %2895 = dma.done.wait (!%p2329_p4), %s2127_s12, 256  }
 0x5bd   : > { %2897 = vsyncadd (!%p2329_p4), %s2127_s12, 4294967040  ;;  %s4342_s29 = sld [smem:[#allocation16_spill]]  ;;  %p25_p5 = scmp.ge.s32.totalorder %s2979_s24, 4  }
 0x5be   : > { %s4343_s18 = smov %s2904_s19  ;;  %s4344_s19 = smov %s2908_s20 }
 0x5bf   : > { %s4346_s21 = smov %s2979_s24  ;;  %27 = sbr.rel (!%p25_p5) target bundleno = 11 (0xb), region = 133 }
 0x5c3   : > { %s4345_s20 = smov %s4342_s29 }
 0x5c6   :  { %2141 = vsyncpa [#allocation3], 1 }
 0x5c7   :  { %2143 = vsyncpa [#allocation3 + $0x1], 1 }
 0x5c8   :  { %2144 = vsyncpa [#allocation6], 1 }
 0x5c9   :  { %2146 = vsyncpa [#allocation6 + $0x1], 1 }
 0x5ca   :  { %2147 = vsyncpa [#allocation4], 1 }
 0x5cb   :  { %2149 = vsyncpa [#allocation4 + $0x1], 1 }
 0x5cc   :  { %2150 = vsyncpa [#allocation10], 1 }
 0x5cd   :  { %2152 = vsyncpa [#allocation10 + $0x1], 1 }

</bundles_post_ra>
